<compile_context>
chip_gen: v7x
topology: tpu7x:2x2x1
jax: 0.10.0
libtpu: 0.0.40
codegen_flags: <defaults>
</compile_context>

<pallas_src>
import jax
import jax.numpy as jnp
from jax import lax
from jax.experimental import pallas as pl
from jax.experimental.pallas import tpu as pltpu


def attend_kernel(a_ref, b_ref, w1_ref, b1_ref, w2_ref, b2_ref,
                  beta_ref, alpha_ref):
    Bb, La, D = a_ref.shape
    _, Lb, _ = b_ref.shape
    H = w1_ref.shape[1]

    A = a_ref[...]            # (Bb, La, D) bf16
    B = b_ref[...]            # (Bb, Lb, D) bf16
    W1 = w1_ref[...]          # (D, H)      bf16
    W2 = w2_ref[...]          # (H, H)      bf16
    b1 = b1_ref[...]          # (1, H)      f32
    b2 = b2_ref[...]          # (1, H)      f32

    # TODO(synk): training-mode Dropout(0.2) is stochastic; eval-mode identity used here.

    # ---- Fused token MLP ---------------------------------------------------
    # One stacked (Bb*(La+Lb), D) operand: W1/W2 go into the MXU once per
    # layer and the M dimension doubles.  bf16 operands, f32 accumulation;
    # bias-add / relu stay in f32.
    rows_a = Bb * La
    x2d = jnp.concatenate([A.reshape(rows_a, D), B.reshape(Bb * Lb, D)], axis=0)
    h = jnp.maximum(
        jnp.dot(x2d, W1, preferred_element_type=jnp.float32) + b1, 0.0)
    fx = jnp.maximum(
        jnp.dot(h.astype(jnp.bfloat16), W2,
                preferred_element_type=jnp.float32) + b2, 0.0)
    fx_bf = fx.astype(jnp.bfloat16)
    fA = fx_bf[:rows_a].reshape(Bb, La, H)       # (Bb, La, H) bf16
    fB = fx_bf[rows_a:].reshape(Bb, Lb, H)       # (Bb, Lb, H) bf16

    # ---- e[b] = fA[b] @ fB[b]^T (batched contraction of the feature axis;
    #      no fB^T materialization / XLU transpose). ---------------------------
    e = lax.dot_general(
        fA, fB,
        dimension_numbers=(((2,), (2,)), ((0,), (0,))),
        preferred_element_type=jnp.float32)       # (Bb, La, Lb) f32

    # ---- Row softmax -> beta (normalization folded as a post-scale) --------
    m_r = jnp.max(e, axis=2, keepdims=True)       # (Bb, La, 1)
    p_r = jnp.exp(e - m_r)                         # (Bb, La, Lb) f32
    inv_r = pl.reciprocal(jnp.sum(p_r, axis=2, keepdims=True), approx=True)
    acc_b = lax.dot_general(
        p_r.astype(jnp.bfloat16), B,
        dimension_numbers=(((2,), (1,)), ((0,), (0,))),
        preferred_element_type=jnp.float32)        # (Bb, La, D) f32
    beta_ref[...] = (acc_b * inv_r).astype(beta_ref.dtype)

    # ---- Column softmax -> alpha --------------------------------------------
    # Reuse the row numerator: exp(e - m_c) = p_r * exp(m_r - m_g) * exp(m_g - m_c)
    # with m_g the per-batch global max.  Only small correction terms hit the
    # single EUP slot; the (Bb,La,Lb) score matrix gets two VALU multiplies
    # instead of a second full-size exp.  e^T is never materialized.
    m_c = jnp.max(e, axis=1, keepdims=True)        # (Bb, 1, Lb)
    m_g = jnp.max(m_c, axis=2, keepdims=True)      # (Bb, 1, 1)
    c_r = jnp.exp(m_r - m_g)                       # (Bb, La, 1), <= 1
    c_c = jnp.exp(m_g - m_c)                       # (Bb, 1, Lb), >= 1
    p_c = (p_r * c_r) * c_c                        # == exp(e - m_c), f32
    inv_c = pl.reciprocal(jnp.sum(p_c, axis=1, keepdims=True), approx=True)  # (Bb,1,Lb)
    acc_a = lax.dot_general(
        p_c.astype(jnp.bfloat16), A,
        dimension_numbers=(((1,), (1,)), ((0,), (0,))),
        preferred_element_type=jnp.float32)        # (Bb, Lb, D) f32
    # Post-scale on the f32 accumulator; tiny (Bb,1,Lb)->(Bb,Lb,1) relayout.
    alpha_ref[...] = (acc_a * inv_c.reshape(Bb, Lb, 1)).astype(alpha_ref.dtype)


def _device_info():
    """Rough generation detection: (tensorcores_per_chip, vmem_bytes, mxu_rows)."""
    kind = ""
    try:
        kind = jax.devices()[0].device_kind.lower()
    except Exception:
        pass
    is_v7 = ("v7" in kind) or ("tpu7" in kind) or ("7x" in kind)
    is_v5e = ("v5e" in kind) or ("v5 lite" in kind) or ("v5lite" in kind)
    num_tc = 2 if is_v7 else 1
    vmem_bytes = (64 if is_v7 else 128) * 1024 * 1024
    mxu_rows = 128 if is_v5e else 256
    return num_tc, vmem_bytes, mxu_rows


def _pick_batch_block(Bn, La, Lb, per_b_bytes, fixed_bytes,
                      num_tc, vmem_bytes, mxu_rows):
    """Largest divisor of Bn subject to (a) a VMEM budget, (b) >=4 grid steps on
    megacore parts (v7x) so DMA overlaps compute on each core, preferring a
    stacked-MLP M dimension that is a multiple of the MXU row count."""
    budget = (6 * vmem_bytes) // 10                       # keep headroom
    max_bb = max(1, min(Bn, (budget - fixed_bytes) // max(per_b_bytes, 1)))
    if num_tc >= 2 and Bn >= 4:
        max_bb = min(max_bb, Bn // 4)                     # >=2 steps per core
    max_bb = max(1, int(max_bb))
    best = None
    L = La + Lb
    for cand in range(max_bb, 0, -1):
        if Bn % cand:
            continue
        if best is None:
            best = cand
        if (cand * L) % mxu_rows == 0:                    # fill whole MXU passes
            return cand
    return best if best is not None else 1


def attend_forward(A, B, W1, b1, W2, b2, *, block_batch=None):
    Bn, La, D = A.shape
    _, Lb, _ = B.shape
    H = W1.shape[1]

    num_tc, vmem_bytes, mxu_rows = _device_info()

    # Per-batch-element VMEM footprint estimate (bytes): double-buffered I/O
    # blocks + live f32/bf16 intermediates (h, fx, e, p_r, p_c, accumulators).
    L = La + Lb
    per_b = (2 * 2 * L * D          # A/B blocks (bf16) x 2 buffers
             + 2 * 4 * L * D        # beta/alpha blocks (f32) x 2 buffers
             + 10 * L * H           # h (f32) + fx (f32 + bf16)
             + 16 * La * Lb         # e, p_r, p_c (f32) + bf16 copies
             + 8 * L * D)           # f32 matmul accumulators
    fixed = 2 * (D * H + H * H) + 8 * H + (1 << 20)       # weights + slack

    if block_batch is not None:
        assert Bn % block_batch == 0, "block_batch must divide batch"
        Bb = block_batch
    else:
        Bb = _pick_batch_block(Bn, La, Lb, per_b, fixed,
                               num_tc, vmem_bytes, mxu_rows)
    grid = (Bn // Bb,)

    vmem_limit = int(min(vmem_bytes * 3 // 4,
                         max(32 * 1024 * 1024, fixed + 2 * Bb * per_b)))

    # Pre-cast once in the wrapper: halves HBM->VMEM DMA bytes and removes
    # per-step pack work inside the kernel.  Biases stay f32 for the adds.
    A_bf = A.astype(jnp.bfloat16)
    B_bf = B.astype(jnp.bfloat16)
    W1_bf = W1.astype(jnp.bfloat16)
    W2_bf = W2.astype(jnp.bfloat16)
    b1_f = b1.astype(jnp.float32)
    b2_f = b2.astype(jnp.float32)

    # TODO(synk): for production-size La/Lb (>=512) add an La grid axis so the
    # (Bb, La, Lb) score matrix does not scale the VMEM live set; for tiny Lb
    # (<128) the score lanes are underfilled — pack batch into lanes if needed.
    beta, alpha = pl.pallas_call(
        attend_kernel,
        out_shape=(jax.ShapeDtypeStruct((Bn, La, D), jnp.float32),
                   jax.ShapeDtypeStruct((Bn, Lb, D), jnp.float32)),
        grid=grid,
        in_specs=[
            pl.BlockSpec((Bb, La, D), lambda i: (i, 0, 0)),   # A block (bf16)
            pl.BlockSpec((Bb, Lb, D), lambda i: (i, 0, 0)),   # B block (bf16)
            pl.BlockSpec((D, H), lambda i: (0, 0)),           # W1 (bf16)
            pl.BlockSpec((1, H), lambda i: (0, 0)),           # b1 (f32)
            pl.BlockSpec((H, H), lambda i: (0, 0)),           # W2 (bf16)
            pl.BlockSpec((1, H), lambda i: (0, 0)),           # b2 (f32)
        ],
        out_specs=(pl.BlockSpec((Bb, La, D), lambda i: (i, 0, 0)),
                   pl.BlockSpec((Bb, Lb, D), lambda i: (i, 0, 0))),
        compiler_params=pltpu.CompilerParams(
            dimension_semantics=("parallel",),
            vmem_limit_bytes=vmem_limit),
    )(A_bf, B_bf, W1_bf, b1_f, W2_bf, b2_f)
    return beta, alpha


def attend_reference(A, B, W1, b1, W2, b2):
    """Pure-JAX f32 reference mirroring the PyTorch forward (eval mode)."""
    def f(x):
        h = jax.nn.relu(x @ W1 + b1)
        return jax.nn.relu(h @ W2 + b2)
    fA, fB = f(A), f(B)
    e = jnp.einsum('bij,bkj->bik', fA, fB)
    beta = jax.nn.softmax(e, axis=-1) @ B
    alpha = jax.nn.softmax(jnp.swapaxes(e, 1, 2), axis=-1) @ A
    return beta, alpha


if __name__ == "__main__":
    # Small shapes consistent with Attend(num_inputs=embed_dim, hidden_dim);
    # D = H = 128 keeps loads / matmuls / stores lane-dense.
    batch, seq_a, seq_b = 8, 16, 8
    embed_dim, hidden_dim = 128, 128

    key = jax.random.PRNGKey(0)
    kA, kB, k1, k2, k3, k4 = jax.random.split(key, 6)

    A = jax.random.normal(kA, (batch, seq_a, embed_dim), dtype=jnp.float32)
    B = jax.random.normal(kB, (batch, seq_b, embed_dim), dtype=jnp.float32)

    # Deterministic synthetic weights for the two Linear layers of `mlp`,
    # stored as (in_dim, out_dim) so the kernel does x @ W + b.
    bound1 = 1.0 / jnp.sqrt(embed_dim)
    bound2 = 1.0 / jnp.sqrt(hidden_dim)
    W1 = jax.random.uniform(k1, (embed_dim, hidden_dim), jnp.float32, -bound1, bound1)
    b1 = jax.random.uniform(k2, (1, hidden_dim), jnp.float32, -bound1, bound1)
    W2 = jax.random.uniform(k3, (hidden_dim, hidden_dim), jnp.float32, -bound2, bound2)
    b2 = jax.random.uniform(k4, (1, hidden_dim), jnp.float32, -bound2, bound2)

    beta, alpha = attend_forward(A, B, W1, b1, W2, b2)
    jax.block_until_ready((beta, alpha))

    beta_ref, alpha_ref = attend_reference(A, B, W1, b1, W2, b2)
    # Loose tolerance vs. the pure-f32 reference: the MLP and all attention
    # matmuls use bf16 operands (f32 accumulation) and the softmax
    # normalizations use the approximate EUP reciprocal.
    assert jnp.allclose(beta, beta_ref, atol=1e-1, rtol=1e-1), (
        float(jnp.max(jnp.abs(beta - beta_ref))))
    assert jnp.allclose(alpha, alpha_ref, atol=1e-1, rtol=1e-1), (
        float(jnp.max(jnp.abs(alpha - alpha_ref))))
    assert beta.shape == (batch, seq_a, embed_dim)
    assert alpha.shape == (batch, seq_b, embed_dim)

    print("KERNEL_OK")
</pallas_src>

<mosaic_0001>
module attributes {stable_mosaic.version = 11 : i64} {
  func.func @attend_kernel(%arg0: i32, %arg1: memref<8x16x128xbf16, #tpu.memory_space<vmem>>, %arg2: memref<8x8x128xbf16, #tpu.memory_space<vmem>>, %arg3: memref<128x128xbf16, #tpu.memory_space<vmem>>, %arg4: memref<1x128xf32, #tpu.memory_space<vmem>>, %arg5: memref<128x128xbf16, #tpu.memory_space<vmem>>, %arg6: memref<1x128xf32, #tpu.memory_space<vmem>>, %arg7: memref<8x16x128xf32, #tpu.memory_space<vmem>>, %arg8: memref<8x8x128xf32, #tpu.memory_space<vmem>>) attributes {dimension_semantics = [#tpu.dimension_semantics<parallel>], iteration_bounds = array<i64: 1>, scalar_prefetch = 0 : i64, scratch_operands = 0 : i64, tpu.core_type = #tpu.core_type<tc>, window_params = [{transform_indices = @transform_0, window_bounds = array<i64: 8, 16, 128>}, {transform_indices = @transform_1, window_bounds = array<i64: 8, 8, 128>}, {pipeline_mode = #tpu.pipeline_mode<synchronous>, transform_indices = @transform_2, window_bounds = array<i64: 128, 128>}, {pipeline_mode = #tpu.pipeline_mode<synchronous>, transform_indices = @transform_3, window_bounds = array<i64: 1, 128>}, {pipeline_mode = #tpu.pipeline_mode<synchronous>, transform_indices = @transform_4, window_bounds = array<i64: 128, 128>}, {pipeline_mode = #tpu.pipeline_mode<synchronous>, transform_indices = @transform_5, window_bounds = array<i64: 1, 128>}, {transform_indices = @transform_6, window_bounds = array<i64: 8, 16, 128>}, {transform_indices = @transform_7, window_bounds = array<i64: 8, 8, 128>}]} {
    %c0 = arith.constant 0 : index
    %c0_0 = arith.constant 0 : index
    %c0_1 = arith.constant 0 : index
    %0 = vector.load %arg1[%c0, %c0_0, %c0_1] : memref<8x16x128xbf16, #tpu.memory_space<vmem>>, vector<8x16x128xbf16>
    %c0_2 = arith.constant 0 : index
    %c0_3 = arith.constant 0 : index
    %c0_4 = arith.constant 0 : index
    %1 = vector.load %arg2[%c0_2, %c0_3, %c0_4] : memref<8x8x128xbf16, #tpu.memory_space<vmem>>, vector<8x8x128xbf16>
    %c0_5 = arith.constant 0 : index
    %c0_6 = arith.constant 0 : index
    %2 = vector.load %arg3[%c0_5, %c0_6] : memref<128x128xbf16, #tpu.memory_space<vmem>>, vector<128x128xbf16>
    %c0_7 = arith.constant 0 : index
    %c0_8 = arith.constant 0 : index
    %3 = vector.load %arg5[%c0_7, %c0_8] : memref<128x128xbf16, #tpu.memory_space<vmem>>, vector<128x128xbf16>
    %c0_9 = arith.constant 0 : index
    %c0_10 = arith.constant 0 : index
    %4 = vector.load %arg4[%c0_9, %c0_10] : memref<1x128xf32, #tpu.memory_space<vmem>>, vector<1x128xf32>
    %c0_11 = arith.constant 0 : index
    %c0_12 = arith.constant 0 : index
    %5 = vector.load %arg6[%c0_11, %c0_12] : memref<1x128xf32, #tpu.memory_space<vmem>>, vector<1x128xf32>
    %6 = vector.shape_cast %0 : vector<8x16x128xbf16> to vector<128x128xbf16>
    %7 = vector.shape_cast %1 : vector<8x8x128xbf16> to vector<64x128xbf16>
    %8 = tpu.concatenate %6, %7 in 0 : vector<128x128xbf16>, vector<64x128xbf16> -> vector<192x128xbf16>
    %cst = arith.constant dense<0.000000e+00> : vector<192x128xf32>
    %9 = tpu.matmul %8, %2, %cst {dimension_numbers = #tpu.dot_dimension_numbers<[1], [0], [0], [1], [0, 0, 1, 1], [], []>} : vector<192x128xbf16>, vector<128x128xbf16>, vector<192x128xf32> -> vector<192x128xf32>
    %10 = vector.broadcast %4 : vector<1x128xf32> to vector<192x128xf32>
    %11 = arith.addf %9, %10 : vector<192x128xf32>
    %cst_13 = arith.constant 0.000000e+00 : f32
    %12 = vector.broadcast %cst_13 : f32 to vector<192x128xf32>
    %13 = arith.maximumf %11, %12 : vector<192x128xf32>
    %14 = arith.truncf %13 : vector<192x128xf32> to vector<192x128xbf16>
    %cst_14 = arith.constant dense<0.000000e+00> : vector<192x128xf32>
    %15 = tpu.matmul %14, %3, %cst_14 {dimension_numbers = #tpu.dot_dimension_numbers<[1], [0], [0], [1], [0, 0, 1, 1], [], []>} : vector<192x128xbf16>, vector<128x128xbf16>, vector<192x128xf32> -> vector<192x128xf32>
    %16 = vector.broadcast %5 : vector<1x128xf32> to vector<192x128xf32>
    %17 = arith.addf %15, %16 : vector<192x128xf32>
    %cst_15 = arith.constant 0.000000e+00 : f32
    %18 = vector.broadcast %cst_15 : f32 to vector<192x128xf32>
    %19 = arith.maximumf %17, %18 : vector<192x128xf32>
    %20 = arith.truncf %19 : vector<192x128xf32> to vector<192x128xbf16>
    %21 = vector.extract_strided_slice %20 {offsets = [0, 0], sizes = [128, 128], strides = [1, 1]} : vector<192x128xbf16> to vector<128x128xbf16>
    %22 = vector.shape_cast %21 : vector<128x128xbf16> to vector<8x16x128xbf16>
    %23 = vector.extract_strided_slice %20 {offsets = [128, 0], sizes = [64, 128], strides = [1, 1]} : vector<192x128xbf16> to vector<64x128xbf16>
    %24 = vector.shape_cast %23 : vector<64x128xbf16> to vector<8x8x128xbf16>
    %cst_16 = arith.constant dense<0.000000e+00> : vector<8x16x8xf32>
    %25 = tpu.matmul %22, %24, %cst_16 {dimension_numbers = #tpu.dot_dimension_numbers<[2], [2], [1], [1], [0, 0, 0, 1, 1, 1], [0], [0]>} : vector<8x16x128xbf16>, vector<8x8x128xbf16>, vector<8x16x8xf32> -> vector<8x16x8xf32>
    %cst_17 = arith.constant dense<0xFF800000> : vector<8x16xf32>
    %26 = vector.multi_reduction <maximumf>, %25, %cst_17 [2] : vector<8x16x8xf32> to vector<8x16xf32>
    %27 = vector.shape_cast %26 : vector<8x16xf32> to vector<8x16x1xf32>
    %28 = vector.broadcast %27 : vector<8x16x1xf32> to vector<8x16x8xf32>
    %29 = arith.subf %25, %28 : vector<8x16x8xf32>
    %30 = math.exp %29 : vector<8x16x8xf32>
    %cst_18 = arith.constant dense<0.000000e+00> : vector<8x16xf32>
    %31 = vector.multi_reduction <add>, %30, %cst_18 [2] : vector<8x16x8xf32> to vector<8x16xf32>
    %32 = vector.shape_cast %31 : vector<8x16xf32> to vector<8x16x1xf32>
    %33 = tpu.reciprocal %32 {approx = true} : vector<8x16x1xf32> -> vector<8x16x1xf32>
    %34 = arith.truncf %30 : vector<8x16x8xf32> to vector<8x16x8xbf16>
    %cst_19 = arith.constant dense<0.000000e+00> : vector<8x16x128xf32>
    %35 = tpu.matmul %34, %1, %cst_19 {dimension_numbers = #tpu.dot_dimension_numbers<[2], [1], [1], [2], [0, 0, 0, 1, 1, 2], [0], [0]>} : vector<8x16x8xbf16>, vector<8x8x128xbf16>, vector<8x16x128xf32> -> vector<8x16x128xf32>
    %36 = vector.broadcast %33 : vector<8x16x1xf32> to vector<8x16x128xf32>
    %37 = arith.mulf %35, %36 : vector<8x16x128xf32>
    %c0_20 = arith.constant 0 : index
    %c0_21 = arith.constant 0 : index
    %c0_22 = arith.constant 0 : index
    %38 = vector.load %arg7[%c0_20, %c0_21, %c0_22] : memref<8x16x128xf32, #tpu.memory_space<vmem>>, vector<8x16x128xf32>
    tpu.vector_store %arg7[%c0_20, %c0_21, %c0_22], %37 {strides = array<i32>} : memref<8x16x128xf32, #tpu.memory_space<vmem>>, vector<8x16x128xf32>,
    %cst_23 = arith.constant dense<0xFF800000> : vector<8x8xf32>
    %39 = vector.multi_reduction <maximumf>, %25, %cst_23 [1] : vector<8x16x8xf32> to vector<8x8xf32>
    %40 = vector.shape_cast %39 : vector<8x8xf32> to vector<8x1x8xf32>
    %cst_24 = arith.constant dense<0xFF800000> : vector<8x1xf32>
    %41 = vector.multi_reduction <maximumf>, %40, %cst_24 [2] : vector<8x1x8xf32> to vector<8x1xf32>
    %42 = vector.shape_cast %41 : vector<8x1xf32> to vector<8x1x1xf32>
    %43 = vector.broadcast %42 : vector<8x1x1xf32> to vector<8x16x1xf32>
    %44 = arith.subf %27, %43 : vector<8x16x1xf32>
    %45 = math.exp %44 : vector<8x16x1xf32>
    %46 = vector.broadcast %42 : vector<8x1x1xf32> to vector<8x1x8xf32>
    %47 = arith.subf %46, %40 : vector<8x1x8xf32>
    %48 = math.exp %47 : vector<8x1x8xf32>
    %49 = vector.broadcast %45 : vector<8x16x1xf32> to vector<8x16x8xf32>
    %50 = arith.mulf %30, %49 : vector<8x16x8xf32>
    %51 = vector.broadcast %48 : vector<8x1x8xf32> to vector<8x16x8xf32>
    %52 = arith.mulf %50, %51 : vector<8x16x8xf32>
    %cst_25 = arith.constant dense<0.000000e+00> : vector<8x8xf32>
    %53 = vector.multi_reduction <add>, %52, %cst_25 [1] : vector<8x16x8xf32> to vector<8x8xf32>
    %54 = vector.shape_cast %53 : vector<8x8xf32> to vector<8x1x8xf32>
    %55 = tpu.reciprocal %54 {approx = true} : vector<8x1x8xf32> -> vector<8x1x8xf32>
    %56 = arith.truncf %52 : vector<8x16x8xf32> to vector<8x16x8xbf16>
    %cst_26 = arith.constant dense<0.000000e+00> : vector<8x8x128xf32>
    %57 = tpu.matmul %56, %0, %cst_26 {dimension_numbers = #tpu.dot_dimension_numbers<[1], [1], [2], [2], [0, 0, 0, 2, 1, 2], [0], [0]>} : vector<8x16x8xbf16>, vector<8x16x128xbf16>, vector<8x8x128xf32> -> vector<8x8x128xf32>
    %58 = vector.shape_cast %55 : vector<8x1x8xf32> to vector<8x8x1xf32>
    %59 = vector.broadcast %58 : vector<8x8x1xf32> to vector<8x8x128xf32>
    %60 = arith.mulf %57, %59 : vector<8x8x128xf32>
    %c0_27 = arith.constant 0 : index
    %c0_28 = arith.constant 0 : index
    %c0_29 = arith.constant 0 : index
    %61 = vector.load %arg8[%c0_27, %c0_28, %c0_29] : memref<8x8x128xf32, #tpu.memory_space<vmem>>, vector<8x8x128xf32>
    tpu.vector_store %arg8[%c0_27, %c0_28, %c0_29], %60 {strides = array<i32>} : memref<8x8x128xf32, #tpu.memory_space<vmem>>, vector<8x8x128xf32>,
    return
  }
  func.func @transform_0(%arg0: i32) -> (i32, i32, i32) {
    %c0_i32 = arith.constant 0 : i32
    %c0_i32_0 = arith.constant 0 : i32
    %c0_i32_1 = arith.constant 0 : i32
    return %arg0, %c0_i32, %c0_i32_0 : i32, i32, i32
  }
  func.func @transform_1(%arg0: i32) -> (i32, i32, i32) {
    %c0_i32 = arith.constant 0 : i32
    %c0_i32_0 = arith.constant 0 : i32
    %c0_i32_1 = arith.constant 0 : i32
    return %arg0, %c0_i32, %c0_i32_0 : i32, i32, i32
  }
  func.func @transform_2(%arg0: i32) -> (i32, i32) {
    %c0_i32 = arith.constant 0 : i32
    %c0_i32_0 = arith.constant 0 : i32
    %c0_i32_1 = arith.constant 0 : i32
    return %c0_i32, %c0_i32_0 : i32, i32
  }
  func.func @transform_3(%arg0: i32) -> (i32, i32) {
    %c0_i32 = arith.constant 0 : i32
    %c0_i32_0 = arith.constant 0 : i32
    %c0_i32_1 = arith.constant 0 : i32
    return %c0_i32, %c0_i32_0 : i32, i32
  }
  func.func @transform_4(%arg0: i32) -> (i32, i32) {
    %c0_i32 = arith.constant 0 : i32
    %c0_i32_0 = arith.constant 0 : i32
    %c0_i32_1 = arith.constant 0 : i32
    return %c0_i32, %c0_i32_0 : i32, i32
  }
  func.func @transform_5(%arg0: i32) -> (i32, i32) {
    %c0_i32 = arith.constant 0 : i32
    %c0_i32_0 = arith.constant 0 : i32
    %c0_i32_1 = arith.constant 0 : i32
    return %c0_i32, %c0_i32_0 : i32, i32
  }
  func.func @transform_6(%arg0: i32) -> (i32, i32, i32) {
    %c0_i32 = arith.constant 0 : i32
    %c0_i32_0 = arith.constant 0 : i32
    %c0_i32_1 = arith.constant 0 : i32
    return %arg0, %c0_i32, %c0_i32_0 : i32, i32, i32
  }
  func.func @transform_7(%arg0: i32) -> (i32, i32, i32) {
    %c0_i32 = arith.constant 0 : i32
    %c0_i32_0 = arith.constant 0 : i32
    %c0_i32_1 = arith.constant 0 : i32
    return %arg0, %c0_i32, %c0_i32_0 : i32, i32, i32
  }
}

</mosaic_0001>

<bundles_post_ra>
// kernel: tpu_custom_call.1
= control target key start
LH: loop header
LB: loop body
LE: loop exit
PB: predicated region body
PF: predicated region fallthrough
CT: control target
= control target key end

     0   :  { %13 = vsyncpa [#allocation3], 0  ;;  %s3776_s0 = inlined_call_operand.hbm [shape: bf16[8,16,128], index: 0, kind: input, shape index: {}]   ;;  %s3777_s1 = inlined_call_operand.hbm [shape: bf16[8,8,128], index: 1, kind: input, shape index: {}]   ;;  %s3778_s2 = inlined_call_operand.hbm [shape: bf16[128,128], index: 2, kind: input, shape index: {}]   ;;  %s3779_s3 = inlined_call_operand.vmem [shape: f32[1,128], index: 3, kind: input, shape index: {}]   ;;  %s3780_s4 = inlined_call_operand.hbm [shape: bf16[128,128], index: 4, kind: input, shape index: {}]   ;;  %s3781_s5 = inlined_call_operand.vmem [shape: f32[1,128], index: 5, kind: input, shape index: {}]   ;;  %s3782_s6 = inlined_call_operand.hbm [shape: f32[8,16,128], index: 6, kind: output, shape index: {0}]   ;;  %s3783_s7 = inlined_call_operand.hbm [shape: f32[8,8,128], index: 7, kind: output, shape index: {1}]  }
   0x1   :  { %14 = vsyncpa [#allocation6], 0 }
   0x2   :  { %15 = vsyncpa [#allocation9], 0 }
   0x3   :  { %16 = vsyncpa [#allocation4], 0 }
   0x4   :  { %17 = vsyncpa [#allocation12], 0  ;;  %s3098_s24 = smov [#allocation5]   ;;  %s3099_s26 = smov [#allocation2]  }
   0x5   :  { %s35_s25 = sshll.u32 %s3098_s24, 4  ;;  %s23_s27 = sshll.u32 %s3099_s26, 4  ;;  %s36_s25 = int_to_ptr.vmem [resolvable:$true] %s35_s25  ;;  %s3150_s27 = int_to_ptr.vmem [resolvable:$true] %s23_s27 }
   0x6   :  { %s2956_s30 = scalar_lea.hbm %s3777_s1, 512 }
   0x7   :  { %p2957_p0 = scmp.ne.s32.totalorder %s3777_s1, %s2956_s30  ;;  %p2960_p1 = scmp.lt.u32.totalorder %s2956_s30, %s3777_s1 }
   0x9   :  { %p2962_p2 = pnand %p2960_p1, %p2957_p0 }
   0xb   :  { %2965 = shalt.err (!%p2962_p2)
}
   0xc   :  { %s2966_s12 = scalar_lea.vmem %s36_s25, 512  ;;  %p2971_p4 = scmp.lt.s32.totalorder %s36_s25, %s36_s25 }
   0xd   :  { %p2967_p3 = scmp.ne.s32.totalorder %s36_s25, %s2966_s12  ;;  %p2972_p5 = scmp.lt.s32.totalorder %s2966_s12, %s2966_s12 }
   0xf   :  { %p2973_p6 = por %p2972_p5, %p2971_p4 }
  0x11   :  { %p2974_p7 = pnand %p2973_p6, %p2967_p3 }
  0x13   :  { %2977 = shalt.err (!%p2974_p7)
}
  0x14   :  { %s3100_s13 = smov 64   ;;  %s3101_s14 = smov 4  }
  0x15   :  { %41 = dma.hbm_to_vmem [thread:$0]  %s3777_s1, 512, %s36_s25, [#allocation6], %s3100_s13, %s3100_s13, %s3101_s14  }
  0x16   :  { %s2978_s19 = scalar_lea.hbm %s3776_s0, 1024 }
  0x17   :  { %p2979_p8 = scmp.ne.s32.totalorder %s3776_s0, %s2978_s19  ;;  %p2982_p9 = scmp.lt.u32.totalorder %s2978_s19, %s3776_s0 }
  0x19   :  { %p2984_p10 = pnand %p2982_p9, %p2979_p8 }
  0x1b   :  { %2987 = shalt.err (!%p2984_p10)
}
  0x1c   :  { %s2988_s24 = scalar_lea.vmem %s3150_s27, 1024  ;;  %p2993_p12 = scmp.lt.s32.totalorder %s3150_s27, %s3150_s27 }
  0x1d   :  { %p2989_p11 = scmp.ne.s32.totalorder %s3150_s27, %s2988_s24  ;;  %p2994_p13 = scmp.lt.s32.totalorder %s2988_s24, %s2988_s24 }
  0x1f   :  { %p2995_p0 = por %p2994_p13, %p2993_p12 }
  0x21   :  { %p2996_p1 = pnand %p2995_p0, %p2989_p11 }
  0x23   :  { %2999 = shalt.err (!%p2996_p1)
}
  0x24   :  { %29 = dma.hbm_to_vmem [thread:$0]  %s3776_s0, 1024, %s3150_s27, [#allocation3], %s3100_s13, %s3100_s13, %s3101_s14  }
  0x25   :  { %s3102_s26 = smov [#allocation7]   ;;  %s3103_s29 = smov [#allocation8]  }
  0x26   :  { %s47_s28 = sshll.u32 %s3102_s26, 4  ;;  %s61_s30 = sshll.u32 %s3103_s29, 4  ;;  %s48_s28 = int_to_ptr.vmem [resolvable:$true] %s47_s28  ;;  %s3187_s30 = int_to_ptr.vmem [resolvable:$true] %s61_s30 }
  0x27   :  { %s3000_s10 = scalar_lea.hbm %s3778_s2, 1024 }
  0x28   :  { %p3001_p2 = scmp.ne.s32.totalorder %s3778_s2, %s3000_s10  ;;  %p3004_p3 = scmp.lt.u32.totalorder %s3000_s10, %s3778_s2 }
  0x2a   :  { %p3006_p4 = pnand %p3004_p3, %p3001_p2 }
  0x2c   :  { %3009 = shalt.err (!%p3006_p4)
}
  0x2d   :  { %s3010_s0 = scalar_lea.vmem %s48_s28, 1024  ;;  %p3015_p6 = scmp.lt.s32.totalorder %s48_s28, %s48_s28 }
  0x2e   :  { %p3011_p5 = scmp.ne.s32.totalorder %s48_s28, %s3010_s0  ;;  %p3016_p7 = scmp.lt.s32.totalorder %s3010_s0, %s3010_s0 }
  0x30   :  { %p3017_p8 = por %p3016_p7, %p3015_p6 }
  0x32   :  { %p3018_p9 = pnand %p3017_p8, %p3011_p5 }
  0x34   :  { %3021 = shalt.err (!%p3018_p9)
}
  0x35   :  { %53 = dma.hbm_to_vmem [thread:$0]  %s3778_s2, 1024, %s48_s28, [#allocation6], %s3100_s13, %s3100_s13, %s3101_s14  }
  0x36   :  { %s3022_s20 = scalar_lea.hbm %s3780_s4, 1024 }
  0x37   :  { %p3023_p10 = scmp.ne.s32.totalorder %s3780_s4, %s3022_s20  ;;  %p3026_p11 = scmp.lt.u32.totalorder %s3022_s20, %s3780_s4 }
  0x39   :  { %p3028_p12 = pnand %p3026_p11, %p3023_p10 }
  0x3b   :  { %3031 = shalt.err (!%p3028_p12)
}
  0x3c   :  { %s3032_s1 = scalar_lea.vmem %s3187_s30, 1024  ;;  %p3037_p0 = scmp.lt.s32.totalorder %s3187_s30, %s3187_s30 }
  0x3d   :  { %p3033_p13 = scmp.ne.s32.totalorder %s3187_s30, %s3032_s1  ;;  %p3038_p1 = scmp.lt.s32.totalorder %s3032_s1, %s3032_s1 }
  0x3f   :  { %p3039_p2 = por %p3038_p1, %p3037_p0 }
  0x41   :  { %p3040_p3 = pnand %p3039_p2, %p3033_p13 }
  0x43   :  { %3043 = shalt.err (!%p3040_p3)
}
  0x44   :  { %67 = dma.hbm_to_vmem [thread:$0]  %s3780_s4, 1024, %s3187_s30, [#allocation9], %s3100_s13, %s3100_s13, %s3101_s14  }
  0x45   :  { %3088 = dma.done.wait [#allocation3], 1024  }
  0x46   :  { %3089 = vsyncadd [#allocation3], 4294966272 }
  0x47   :  { %3090 = dma.done.wait [#allocation6], 1536  }
  0x48   :  { %3091 = vsyncadd [#allocation6], 4294965760 }
  0x49   :  { %3092 = dma.done.wait [#allocation9], 1024  }
  0x4a   :  { %3093 = vsyncadd [#allocation9], 4294966272  ;;  %v2792_v0 = vld [vmem:[#allocation7] sm:$0xff]   ;;  %v2793_v1 = vld [vmem:[#allocation7 + $0x8] sm:$0xff]   ;;  %vm3105_vm0 = vmmov 0   ;;  %vm1007_vm1 = vcmask 64512  }
  0x4b   :  { %2555 = vmatprep.subr.bf16.mxu0 %v2792_v0  ;;  %v2794_v2 = vld [vmem:[#allocation7 + $0x10] sm:$0xff]   ;;  %v2795_v3 = vld [vmem:[#allocation7 + $0x18] sm:$0xff]   ;;  %v2800_v4 = vld [vmem:[#allocation2] sm:$0xff]   ;;  %vm1179_vm2 = vcmask 1043456   ;;  %vm1873_vm3 = vcmask 130048  }
  0x4c   :  { %2556 = vmatpush3.bf16.msra.mxu0 %v2792_v0  ;;  %2571 = vmatprep.mubr.bf16.mxu0 %v2800_v4  ;;  %v2796_v5 = vld [vmem:[#allocation7 + $0x20] sm:$0xff]   ;;  %v2797_v6 = vld [vmem:[#allocation7 + $0x28] sm:$0xff]   ;;  %v2798_v7 = vld [vmem:[#allocation7 + $0x30] sm:$0xff]  }
  0x4d   :  { %2557 = vmatprep.subr.bf16.mxu0 %v2793_v1  ;;  %v2812_v8 = vld [vmem:[#allocation8] sm:$0xff]   ;;  %v2813_v9 = vld [vmem:[#allocation8 + $0x8] sm:$0xff]   ;;  %v2814_v10 = vld [vmem:[#allocation8 + $0x10] sm:$0xff]  }
  0x4e   :  { %2595 = vmatprep.subr.bf16.mxu1 %v2812_v8  ;;  %v2799_v11 = vld [vmem:[#allocation7 + $0x38] sm:$0xff]   ;;  %v2801_v13 = vld [vmem:[#allocation2 + $0x8] sm:$0xff]   ;;  %v2802_v14 = vld [vmem:[#allocation2 + $0x10] sm:$0xff]  }
  0x4f   :  { %2596 = vmatpush3.bf16.msra.mxu1 %v2812_v8  ;;  %v2815_v12 = vld [vmem:[#allocation8 + $0x18] sm:$0xff]   ;;  %v2816_v15 = vld [vmem:[#allocation8 + $0x20] sm:$0xff]   ;;  %v2817_v16 = vld [vmem:[#allocation8 + $0x28] sm:$0xff]  }
  0x50   :  { %2558 = vmatpush3.bf16.msra.mxu0 %v2793_v1  ;;  %2597 = vmatprep.subr.bf16.mxu1 %v2813_v9  ;;  %v2803_v17 = vld [vmem:[#allocation2 + $0x18] sm:$0xff]   ;;  %v2804_v18 = vld [vmem:[#allocation2 + $0x20] sm:$0xff]   ;;  %v2805_v19 = vld [vmem:[#allocation2 + $0x28] sm:$0xff]  }
  0x51   :  { %2559 = vmatprep.subr.bf16.mxu0 %v2794_v2  ;;  %v2806_v20 = vld [vmem:[#allocation2 + $0x30] sm:$0xff]   ;;  %v3224_v21 = vld [vmem:[#allocation5] sm:$0xf]  ;;  %v3226_v22 = vld [vmem:[#allocation5 + $0x4] sm:$0xf] }
  0x52   :  { %v2807_v23 = vld [vmem:[#allocation2 + $0x38] sm:$0xff]   ;;  %v2413_v24 = vcombine.low %v3224_v21, %v3226_v22  ;;  %v3230_v25 = vld [vmem:[#allocation5 + $0x8] sm:$0xf]  ;;  %v3232_v26 = vld [vmem:[#allocation5 + $0xc] sm:$0xf] }
  0x53   :  { %2598 = vmatpush3.bf16.msra.mxu1 %v2813_v9  ;;  %v3234_v27 = vld [vmem:[#allocation5 + $0x10] sm:$0xf]  ;;  %v3236_v28 = vld [vmem:[#allocation5 + $0x14] sm:$0xf]  ;;  %v2414_v29 = vcombine.low %v3230_v25, %v3232_v26  ;;  %v3242_v31 = vld [vmem:[#allocation5 + $0x18] sm:$0xf] }
  0x54   :  { %2560 = vmatpush3.bf16.msra.mxu0 %v2794_v2  ;;  %2599 = vmatprep.subr.bf16.mxu1 %v2814_v10  ;;  %v2415_v30 = vcombine.low %v3234_v27, %v3236_v28  ;;  %v3244_v32 = vld [vmem:[#allocation5 + $0x1c] sm:$0xf]  ;;  %v2818_v34 = vld [vmem:[#allocation8 + $0x30] sm:$0xff]   ;;  %v3251_v36 = vld [vmem:[%s3779_s3] ss:$0 sm:$0xff] }
  0x55   :  { %2561 = vmatprep.subr.bf16.mxu0 %v2795_v3  ;;  %v2416_v33 = vcombine.low %v3242_v31, %v3244_v32  ;;  %v2819_v35 = vld [vmem:[#allocation8 + $0x38] sm:$0xff]  }
  0x57   :  { %2600 = vmatpush3.bf16.msra.mxu1 %v2814_v10 }
  0x58   :  { %2562 = vmatpush3.bf16.msra.mxu0 %v2795_v3  ;;  %2601 = vmatprep.subr.bf16.mxu1 %v2815_v12 }
  0x59   :  { %2563 = vmatprep.subr.bf16.mxu0 %v2796_v5 }
  0x5b   :  { %2602 = vmatpush3.bf16.msra.mxu1 %v2815_v12 }
  0x5c   :  { %2564 = vmatpush3.bf16.msra.mxu0 %v2796_v5  ;;  %2603 = vmatprep.subr.bf16.mxu1 %v2816_v15 }
  0x5d   :  { %2565 = vmatprep.subr.bf16.mxu0 %v2797_v6 }
  0x5f   :  { %2604 = vmatpush3.bf16.msra.mxu1 %v2816_v15 }
  0x60   :  { %2566 = vmatpush3.bf16.msra.mxu0 %v2797_v6  ;;  %2605 = vmatprep.subr.bf16.mxu1 %v2817_v16 }
  0x61   :  { %2567 = vmatprep.subr.bf16.mxu0 %v2798_v7 }
  0x63   :  { %2606 = vmatpush3.bf16.msra.mxu1 %v2817_v16 }
  0x64   :  { %2568 = vmatpush3.bf16.msra.mxu0 %v2798_v7  ;;  %2607 = vmatprep.subr.bf16.mxu1 %v2818_v34 }
  0x65   :  { %2569 = vmatprep.subr.bf16.mxu0 %v2799_v11 }
  0x67   :  { %2608 = vmatpush3.bf16.msra.mxu1 %v2818_v34 }
  0x68   :  { %2570 = vmatpush3.bf16.msra.mxu0 %v2799_v11  ;;  %2609 = vmatprep.subr.bf16.mxu1 %v2819_v35 }
  0x6b   :  { %2572 = vmatmul.mubr.bf16.vlgmr.msra.gmra.mrb[0].mxu0 %v2801_v13  ;;  %2610 = vmatpush3.bf16.msra.mxu1 %v2819_v35 }
  0x6c   :  { %2575 = vmatprep.mubr.bf16.mxu0 %v2802_v14 }
  0x73   :  { %2576 = vmatmul.mubr.bf16.gmra.mrb[4].mxu0 %v2803_v17 }
  0x74   :  { %2579 = vmatprep.mubr.bf16.mxu0 %v2804_v18 }
  0x7b   :  { %2580 = vmatmul.mubr.bf16.gmra.mrb[8].mxu0 %v2805_v19 }
  0x7c   :  { %2583 = vmatprep.mubr.bf16.mxu0 %v2806_v20 }
  0x83   :  { %2584 = vmatmul.mubr.bf16.gmra.mrb[12].mxu0 %v2807_v23 }
  0x84   :  { %2587 = vmatprep.mubr.bf16.mxu0 %v2413_v24 }
  0x8b   :  { %2588 = vmatmul.mubr.bf16.gmra.mrb[16].mxu0 %v2414_v29 }
  0x8c   :  { %2591 = vmatprep.mubr.bf16.mxu0 %v2415_v30 }
  0x93   :  { %2592 = vmatmul.mubr.bf16.gmra.mrb[20].mxu0 %v2416_v33 }
 0x13e   :  { %v2573_v37 = vpop.f32.mrb[0].mxu0 }
 0x13f   :  { %v310_v38 = vadd.f32 %v2573_v37, %v3251_v36  ;;  %v301_v39 = vpop.f32.mrb[1].mxu0 }
 0x140   :  { %v302_v40 = vadd.f32 %v3251_v36, %v301_v39  ;;  %v2574_v41 = vpop.f32.mrb[2].mxu0 }
 0x141   :  { %v313_v42 = vadd.f32 %v2574_v41, %v3251_v36  ;;  %v304_v43 = vpop.f32.mrb[3].mxu0  ;;  %v398_v45 = vmax.f32 %v310_v38, 0.0 }
 0x142   :  { %v305_v44 = vadd.f32 %v3251_v36, %v304_v43  ;;  %v396_v47 = vmax.f32 %v302_v40, 0.0 }
 0x143   :  { %v399_v46 = vmax.f32 %v313_v42, 0.0 }
 0x144   :  { %v397_v48 = vmax.f32 %v305_v44, 0.0 }
 0x145   :  { %v421_v49 = vpack.c.bf16 %v399_v46, %v398_v45 }
 0x146   :  { %v2577_v50 = vpop.f32.mrb[4].mxu0  ;;  %v420_v51 = vpack.c.bf16 %v397_v48, %v396_v47 }
 0x147   :  { %v326_v52 = vadd.f32 %v2577_v50, %v3251_v36  ;;  %v317_v53 = vpop.f32.mrb[5].mxu0 }
 0x148   :  { %v318_v54 = vadd.f32 %v3251_v36, %v317_v53  ;;  %v2578_v55 = vpop.f32.mrb[6].mxu0  ;;  %2611 = vmatprep.mubr.bf16.mxu1 %v420_v51 }
 0x149   :  { %v329_v56 = vadd.f32 %v2578_v55, %v3251_v36  ;;  %v320_v57 = vpop.f32.mrb[7].mxu0  ;;  %2612 = vmatmul.mubr.bf16.vlgmr.msra.gmra.mrb[0].mxu1 %v421_v49  ;;  %v402_v59 = vmax.f32 %v326_v52, 0.0 }
 0x14a   :  { %v321_v58 = vadd.f32 %v3251_v36, %v320_v57  ;;  %v400_v61 = vmax.f32 %v318_v54, 0.0 }
 0x14b   :  { %v403_v60 = vmax.f32 %v329_v56, 0.0 }
 0x14c   :  { %v401_v62 = vmax.f32 %v321_v58, 0.0 }
 0x14d   :  { %v423_v63 = vpack.c.bf16 %v403_v60, %v402_v59 }
 0x14e   :  { %v422_v0 = vpack.c.bf16 %v401_v62, %v400_v61  ;;  %v2581_v1 = vpop.f32.mrb[8].mxu0 }
 0x14f   :  { %v342_v2 = vadd.f32 %v2581_v1, %v3251_v36  ;;  %v333_v3 = vpop.f32.mrb[9].mxu0 }
 0x150   :  { %v334_v4 = vadd.f32 %v3251_v36, %v333_v3  ;;  %v2582_v5 = vpop.f32.mrb[10].mxu0  ;;  %2615 = vmatprep.mubr.bf16.mxu1 %v422_v0 }
 0x151   :  { %v345_v6 = vadd.f32 %v2582_v5, %v3251_v36  ;;  %v336_v7 = vpop.f32.mrb[11].mxu0  ;;  %2616 = vmatmul.mubr.bf16.gmra.mrb[4].mxu1 %v423_v63  ;;  %v406_v9 = vmax.f32 %v342_v2, 0.0  ;;  %v3104_v2 = vmov 0.0  }
 0x152   :  { %v337_v8 = vadd.f32 %v3251_v36, %v336_v7  ;;  %v404_v11 = vmax.f32 %v334_v4, 0.0  ;;  %2635 = vmatprep.subr.bf16.mxu0 %v3104_v2  ;;  %2641 = vmatprep.subr.bf16.mxu1 %v3104_v2 }
 0x153   :  { %v407_v10 = vmax.f32 %v345_v6, 0.0  ;;  %2637 = vmatprep.mubr.msk.bf16.mxu0 %vm3105_vm0, %v3104_v2 }
 0x154   :  { %v405_v12 = vmax.f32 %v337_v8, 0.0 }
 0x155   :  { %v425_v13 = vpack.c.bf16 %v407_v10, %v406_v9 }
 0x156   :  { %v424_v14 = vpack.c.bf16 %v405_v12, %v404_v11  ;;  %v2585_v15 = vpop.f32.mrb[12].mxu0 }
 0x157   :  { %v358_v16 = vadd.f32 %v2585_v15, %v3251_v36  ;;  %v349_v17 = vpop.f32.mrb[13].mxu0 }
 0x158   :  { %v350_v18 = vadd.f32 %v3251_v36, %v349_v17  ;;  %v2586_v19 = vpop.f32.mrb[14].mxu0  ;;  %2619 = vmatprep.mubr.bf16.mxu1 %v424_v14 }
 0x159   :  { %v361_v20 = vadd.f32 %v2586_v19, %v3251_v36  ;;  %v352_v23 = vpop.f32.mrb[15].mxu0  ;;  %2620 = vmatmul.mubr.bf16.gmra.mrb[8].mxu1 %v425_v13  ;;  %v410_v29 = vmax.f32 %v358_v16, 0.0 }
 0x15a   :  { %v353_v24 = vadd.f32 %v3251_v36, %v352_v23  ;;  %v408_v33 = vmax.f32 %v350_v18, 0.0 }
 0x15b   :  { %v411_v30 = vmax.f32 %v361_v20, 0.0 }
 0x15c   :  { %v409_v34 = vmax.f32 %v353_v24, 0.0 }
 0x15d   :  { %v427_v35 = vpack.c.bf16 %v411_v30, %v410_v29 }
 0x15e   :  { %v426_v37 = vpack.c.bf16 %v409_v34, %v408_v33  ;;  %v2589_v38 = vpop.f32.mrb[16].mxu0 }
 0x15f   :  { %v374_v39 = vadd.f32 %v2589_v38, %v3251_v36  ;;  %v365_v40 = vpop.f32.mrb[17].mxu0 }
 0x160   :  { %v366_v41 = vadd.f32 %v3251_v36, %v365_v40  ;;  %v2590_v42 = vpop.f32.mrb[18].mxu0  ;;  %2623 = vmatprep.mubr.bf16.mxu1 %v426_v37 }
 0x161   :  { %v377_v43 = vadd.f32 %v2590_v42, %v3251_v36  ;;  %v368_v44 = vpop.f32.mrb[19].mxu0  ;;  %2624 = vmatmul.mubr.bf16.gmra.mrb[12].mxu1 %v427_v35  ;;  %v414_v46 = vmax.f32 %v374_v39, 0.0 }
 0x162   :  { %v369_v45 = vadd.f32 %v3251_v36, %v368_v44  ;;  %v412_v48 = vmax.f32 %v366_v41, 0.0 }
 0x163   :  { %v415_v47 = vmax.f32 %v377_v43, 0.0 }
 0x164   :  { %v413_v49 = vmax.f32 %v369_v45, 0.0 }
 0x165   :  { %v429_v50 = vpack.c.bf16 %v415_v47, %v414_v46 }
 0x166   :  { %v428_v51 = vpack.c.bf16 %v413_v49, %v412_v48  ;;  %v2593_v52 = vpop.f32.mrb[20].mxu0 }
 0x167   :  { %v390_v53 = vadd.f32 %v2593_v52, %v3251_v36  ;;  %v381_v54 = vpop.f32.mrb[21].mxu0 }
 0x168   :  { %2627 = vmatprep.mubr.bf16.mxu1 %v428_v51  ;;  %v382_v55 = vadd.f32 %v3251_v36, %v381_v54  ;;  %v2594_v56 = vpop.f32.mrb[22].mxu0 }
 0x169   :  { %2628 = vmatmul.mubr.bf16.gmra.mrb[16].mxu1 %v429_v50  ;;  %v418_v57 = vmax.f32 %v390_v53, 0.0  ;;  %v393_v58 = vadd.f32 %v2594_v56, %v3251_v36  ;;  %v384_v59 = vpop.f32.mrb[23].mxu0 }
 0x16a   :  { %v416_v60 = vmax.f32 %v382_v55, 0.0  ;;  %v385_v61 = vadd.f32 %v3251_v36, %v384_v59  ;;  %v3286_v36 = vld [vmem:[%s3781_s5] ss:$0 sm:$0xff]  ;;  %s3106_s5 = smov [#allocation10]  }
 0x16b   :  { %v419_v62 = vmax.f32 %v393_v58, 0.0  ;;  %s2375_s26 = sshll.u32 %s3106_s5, 4  ;;  %s2376_s26 = int_to_ptr.vmem [resolvable:$true] %s2375_s26 }
 0x16c   :  { %v417_v63 = vmax.f32 %v385_v61, 0.0  ;;  %s3044_s28 = scalar_lea.vmem %s2376_s26, 2048  ;;  %p3049_p5 = scmp.lt.s32.totalorder %s2376_s26, %s2376_s26 }
 0x16d   :  { %v431_v0 = vpack.c.bf16 %v419_v62, %v418_v57  ;;  %p3045_p4 = scmp.ne.s32.totalorder %s2376_s26, %s3044_s28  ;;  %p3050_p6 = scmp.lt.s32.totalorder %s3044_s28, %s3044_s28 }
 0x16e   :  { %v430_v1 = vpack.c.bf16 %v417_v63, %v416_v60 }
 0x16f   :  { %p3051_p7 = por %p3050_p6, %p3049_p5 }
 0x170   :  { %2631 = vmatprep.mubr.bf16.mxu1 %v430_v1 }
 0x171   :  { %2632 = vmatmul.mubr.bf16.gmra.mrb[20].mxu1 %v431_v0  ;;  %p3052_p8 = pnand %p3051_p7, %p3045_p4 }
 0x172   :  { %2643 = vmatprep.mubr.msk.bf16.mxu1 %vm3105_vm0, %v3104_v2 }
 0x21c   :  { %v2613_v3 = vpop.f32.mrb[0].mxu1 }
 0x21d   :  { %v529_v4 = vadd.f32 %v2613_v3, %v3286_v36  ;;  %v520_v5 = vpop.f32.mrb[1].mxu1 }
 0x21e   :  { %v521_v6 = vadd.f32 %v3286_v36, %v520_v5  ;;  %v2614_v7 = vpop.f32.mrb[2].mxu1 }
 0x21f   :  { %v532_v8 = vadd.f32 %v2614_v7, %v3286_v36  ;;  %v523_v9 = vpop.f32.mrb[3].mxu1  ;;  %v617_v11 = vmax.f32 %v529_v4, 0.0 }
 0x220   :  { %v524_v10 = vadd.f32 %v3286_v36, %v523_v9  ;;  %v615_v13 = vmax.f32 %v521_v6, 0.0 }
 0x221   :  { %v618_v12 = vmax.f32 %v532_v8, 0.0 }
 0x222   :  { %v616_v14 = vmax.f32 %v524_v10, 0.0 }
 0x223   :  { %v3292_v15 = vpack.c.bf16 %v618_v12, %v617_v11 }
 0x224   :  { %v3294_v16 = vpack.c.bf16 %v616_v14, %v615_v13  ;;  %v2617_v17 = vpop.f32.mrb[4].mxu1 }
 0x225   :  { %v545_v18 = vadd.f32 %v2617_v17, %v3286_v36  ;;  %v536_v19 = vpop.f32.mrb[5].mxu1 }
 0x226   :  { %v537_v20 = vadd.f32 %v3286_v36, %v536_v19  ;;  %v2618_v23 = vpop.f32.mrb[6].mxu1 }
 0x227   :  { %v548_v24 = vadd.f32 %v2618_v23, %v3286_v36  ;;  %v539_v29 = vpop.f32.mrb[7].mxu1  ;;  %v621_v33 = vmax.f32 %v545_v18, 0.0 }
 0x228   :  { %v540_v30 = vadd.f32 %v3286_v36, %v539_v29  ;;  %v619_v35 = vmax.f32 %v537_v20, 0.0 }
 0x229   :  { %v622_v34 = vmax.f32 %v548_v24, 0.0 }
 0x22a   :  { %v620_v37 = vmax.f32 %v540_v30, 0.0 }
 0x22b   :  { %v3300_v38 = vpack.c.bf16 %v622_v34, %v621_v33 }
 0x22c   :  { %v3302_v39 = vpack.c.bf16 %v620_v37, %v619_v35  ;;  %v2621_v40 = vpop.f32.mrb[8].mxu1 }
 0x22d   :  { %v561_v41 = vadd.f32 %v2621_v40, %v3286_v36  ;;  %v552_v42 = vpop.f32.mrb[9].mxu1 }
 0x22e   :  { %v553_v43 = vadd.f32 %v3286_v36, %v552_v42  ;;  %v2622_v44 = vpop.f32.mrb[10].mxu1 }
 0x22f   :  { %v564_v45 = vadd.f32 %v2622_v44, %v3286_v36  ;;  %v555_v46 = vpop.f32.mrb[11].mxu1  ;;  %v625_v48 = vmax.f32 %v561_v41, 0.0 }
 0x230   :  { %v556_v47 = vadd.f32 %v3286_v36, %v555_v46  ;;  %v623_v50 = vmax.f32 %v553_v43, 0.0 }
 0x231   :  { %v626_v49 = vmax.f32 %v564_v45, 0.0 }
 0x232   :  { %v624_v51 = vmax.f32 %v556_v47, 0.0 }
 0x233   :  { %v3308_v52 = vpack.c.bf16 %v626_v49, %v625_v48 }
 0x234   :  { %v3310_v53 = vpack.c.bf16 %v624_v51, %v623_v50  ;;  %v2625_v54 = vpop.f32.mrb[12].mxu1 }
 0x235   :  { %v577_v55 = vadd.f32 %v2625_v54, %v3286_v36  ;;  %v568_v56 = vpop.f32.mrb[13].mxu1 }
 0x236   :  { %v569_v57 = vadd.f32 %v3286_v36, %v568_v56  ;;  %v2626_v58 = vpop.f32.mrb[14].mxu1 }
 0x237   :  { %v580_v59 = vadd.f32 %v2626_v58, %v3286_v36  ;;  %v571_v60 = vpop.f32.mrb[15].mxu1  ;;  %v629_v62 = vmax.f32 %v577_v55, 0.0 }
 0x238   :  { %v572_v61 = vadd.f32 %v3286_v36, %v571_v60  ;;  %v627_v0 = vmax.f32 %v569_v57, 0.0 }
 0x239   :  { %v630_v63 = vmax.f32 %v580_v59, 0.0 }
 0x23a   :  { %v628_v1 = vmax.f32 %v572_v61, 0.0 }
 0x23b   :  { %v3316_v3 = vpack.c.bf16 %v630_v63, %v629_v62 }
 0x23c   :  { %v645_v4 = vpack.c.bf16 %v628_v1, %v627_v0  ;;  %v2629_v5 = vpop.f32.mrb[16].mxu1 }
 0x23d   :  { %v584_v6 = vpop.f32.mrb[17].mxu1  ;;  %v593_v12 = vadd.f32 %v2629_v5, %v3286_v36 }
 0x23e   :  { %v585_v7 = vadd.f32 %v3286_v36, %v584_v6  ;;  %v2630_v8 = vpop.f32.mrb[18].mxu1 }
 0x23f   :  { %v587_v9 = vpop.f32.mrb[19].mxu1  ;;  %v596_v17 = vadd.f32 %v2630_v8, %v3286_v36  ;;  %v633_v23 = vmax.f32 %v593_v12, 0.0 }
 0x240   :  { %v631_v10 = vmax.f32 %v585_v7, 0.0  ;;  %v588_v11 = vadd.f32 %v3286_v36, %v587_v9 }
 0x241   :  { %v634_v30 = vmax.f32 %v596_v17, 0.0  ;;  %v2461_v33 = vpack.c.bf16 %v633_v23, %v633_v23 }
 0x242   :  { %v2459_v13 = vpack.c.bf16 %v631_v10, %v631_v10  ;;  %v632_v14 = vmax.f32 %v588_v11, 0.0 }
 0x243   :  { %v2462_v35 = vpack.c.bf16 %v634_v30, %v634_v30 }
 0x244   :  { %v2460_v18 = vpack.c.bf16 %v632_v14, %v632_v14  ;;  %2636 = vmatpush3.bf16.xpose.msra.mxu0 %v2459_v13  ;;  %v2633_v19 = vpop.f32.mrb[20].mxu1 }
 0x245   :  { %2647 = vmatprep.subr.bf16.mxu0 %v3104_v2  ;;  %v600_v20 = vpop.f32.mrb[21].mxu1 }
 0x246   :  { %2642 = vmatpush3.bf16.xpose.msra.mxu1 %v2460_v18  ;;  %v2634_v24 = vpop.f32.mrb[22].mxu1  ;;  %v601_v34 = vadd.f32 %v3286_v36, %v600_v20 }
 0x247   :  { %2653 = vmatprep.subr.bf16.mxu1 %v3104_v2  ;;  %v603_v29 = vpop.f32.mrb[23].mxu1  ;;  %v612_v43 = vadd.f32 %v2634_v24, %v3286_v36 }
 0x248   :  { %v604_v37 = vadd.f32 %v3286_v36, %v603_v29  ;;  %v635_v40 = vmax.f32 %v601_v34, 0.0 }
 0x249   :  { %v638_v45 = vmax.f32 %v612_v43, 0.0 }
 0x24a   :  { %v636_v41 = vmax.f32 %v604_v37, 0.0  ;;  %v2463_v42 = vpack.c.bf16 %v635_v40, %v635_v40 }
 0x24b   :  { %2638 = vmatmul.mubr.bf16.vlgmr.msra.gmra.mrb[24].mxu0 %v3294_v16  ;;  %v609_v16 = vadd.f32 %v2633_v19, %v3286_v36  ;;  %v2466_v36 = vpack.c.bf16 %v638_v45, %v638_v45 }
 0x24c   :  { %2648 = vmatpush3.bf16.xpose.msra.mxu0 %v2461_v33  ;;  %2649 = vmatprep.mubr.msk.bf16.mxu0 %vm3105_vm0, %v3104_v2  ;;  %v2464_v44 = vpack.c.bf16 %v636_v41, %v636_v41 }
 0x24d   :  { %2644 = vmatmul.mubr.bf16.vlgmr.msra.gmra.mrb[24].mxu1 %v3292_v15  ;;  %2659 = vmatprep.subr.bf16.mxu0 %v3104_v2  ;;  %v637_v15 = vmax.f32 %v609_v16, 0.0 }
 0x24e   :  { %2654 = vmatpush3.bf16.xpose.msra.mxu1 %v2462_v35  ;;  %2655 = vmatprep.mubr.msk.bf16.mxu1 %vm3105_vm0, %v3104_v2 }
 0x24f   :  { %2665 = vmatprep.subr.bf16.mxu1 %v3104_v2 }
 0x253   :  { %2650 = vmatmul.mubr.bf16.vlgmr.msra.gmra.mrb[28].mxu0 %v3302_v39  ;;  %v2465_v39 = vpack.c.bf16 %v637_v15, %v637_v15 }
 0x254   :  { %2660 = vmatpush3.bf16.xpose.msra.mxu0 %v2463_v42  ;;  %2661 = vmatprep.mubr.msk.bf16.mxu0 %vm3105_vm0, %v3104_v2 }
 0x255   :  { %2656 = vmatmul.mubr.bf16.vlgmr.msra.gmra.mrb[28].mxu1 %v3300_v38  ;;  %2671 = vmatprep.subr.bf16.mxu0 %v3104_v2 }
 0x256   :  { %2666 = vmatpush3.bf16.xpose.msra.mxu1 %v2464_v44  ;;  %2667 = vmatprep.mubr.msk.bf16.mxu1 %vm3105_vm0, %v3104_v2 }
 0x257   :  { %2677 = vmatprep.subr.bf16.mxu1 %v3104_v2 }
 0x25b   :  { %2662 = vmatmul.mubr.bf16.vlgmr.msra.gmra.mrb[32].mxu0 %v3310_v53 }
 0x25c   :  { %2672 = vmatpush3.bf16.xpose.msra.mxu0 %v2465_v39  ;;  %2673 = vmatprep.mubr.msk.bf16.mxu0 %vm3105_vm0, %v3104_v2 }
 0x25d   :  { %2668 = vmatmul.mubr.bf16.vlgmr.msra.gmra.mrb[32].mxu1 %v3308_v52  ;;  %2683 = vmatprep.subr.bf16.mxu0 %v3104_v2 }
 0x25e   :  { %2678 = vmatpush3.bf16.xpose.msra.mxu1 %v2466_v36  ;;  %2679 = vmatprep.mubr.msk.bf16.mxu1 %vm3105_vm0, %v3104_v2 }
 0x25f   :  { %2689 = vmatprep.subr.bf16.mxu1 %v3104_v2 }
 0x263   :  { %2674 = vmatmul.mubr.bf16.vlgmr.msra.gmra.mrb[36].mxu0 %v645_v4 }
 0x264   :  { %2685 = vmatprep.mubr.msk.bf16.mxu0 %vm3105_vm0, %v3104_v2 }
 0x265   :  { %2680 = vmatmul.mubr.bf16.vlgmr.msra.gmra.mrb[36].mxu1 %v3316_v3 }
 0x266   :  { %2691 = vmatprep.mubr.msk.bf16.mxu1 %vm3105_vm0, %v3104_v2 }
 0x31e   :  { %v3357_v38 = vpop.f32.mrb[24].mxu0 }
 0x31f   :  { %v2639_v46 = vpop.f32.mrb[25].mxu0  ;;  %v1008_v47 = vsel %vm1007_vm1, %v3357_v38, -inf }
 0x320   :  { %v3361_v48 = vpop.f32.mrb[24].mxu1  ;;  %1009 = vmax.xlane.f32.xlu0 %v1008_v47  ;;  %v3363_v49 = vpop.f32.mrb[26].mxu0 }
 0x321   :  { %v2640_v50 = vpop.f32.mrb[27].mxu0  ;;  %v2645_v51 = vpop.f32.mrb[25].mxu1  ;;  %v1014_v52 = vsel %vm1007_vm1, %v3361_v48, -inf  ;;  %v1011_v53 = vsel %vm1007_vm1, %v3363_v49, -inf }
 0x322   :  { %1015 = vmax.xlane.f32.xlu1 %v1014_v52  ;;  %v3369_v54 = vpop.f32.mrb[26].mxu1  ;;  %v1585_v55 = vmax.f32 %v1008_v47, %v1011_v53 }
 0x323   :  { %v2646_v56 = vpop.f32.mrb[27].mxu1  ;;  %v1017_v57 = vsel %vm1007_vm1, %v3369_v54, -inf }
 0x324   :  { %1012 = vmax.xlane.f32.xlu0 %v1011_v53  ;;  %v1586_v58 = vrot.slane %v1585_v55, 4  ;;  %v1592_v59 = vmax.f32 %v1014_v52, %v1017_v57 }
 0x326   :  { %v1587_v60 = vmax.f32 %v1585_v55, %v1586_v58  ;;  %1018 = vmax.xlane.f32.xlu1 %v1017_v57  ;;  %v1593_v61 = vrot.slane %v1592_v59, 4  ;;  %v3373_v62 = vpop.f32.mrb[28].mxu0 }
 0x327   :  { %v2651_v63 = vpop.f32.mrb[29].mxu0  ;;  %v1020_v0 = vsel %vm1007_vm1, %v3373_v62, -inf }
 0x328   :  { %v1588_v1 = vrot.slane %v1587_v60, 2  ;;  %v1594_v3 = vmax.f32 %v1592_v59, %v1593_v61  ;;  %v3377_v4 = vpop.f32.mrb[28].mxu1  ;;  %1021 = vmax.xlane.f32.xlu0 %v1020_v0  ;;  %v3379_v5 = vpop.f32.mrb[30].mxu0 }
 0x329   :  { %v2652_v6 = vpop.f32.mrb[31].mxu0  ;;  %v2657_v7 = vpop.f32.mrb[29].mxu1  ;;  %v1023_v8 = vsel %vm1007_vm1, %v3379_v5, -inf  ;;  %v1026_v14 = vsel %vm1007_vm1, %v3377_v4, -inf }
 0x32a   :  { %v1595_v9 = vrot.slane %v1594_v3, 2  ;;  %v3383_v10 = vpop.f32.mrb[30].mxu1  ;;  %1024 = vmax.xlane.f32.xlu1 %v1023_v8  ;;  %v1599_v11 = vmax.f32 %v1020_v0, %v1023_v8  ;;  %v1589_v12 = vmax.f32 %v1587_v60, %v1588_v1 }
 0x32b   :  { %v2658_v13 = vpop.f32.mrb[31].mxu1  ;;  %v1029_v17 = vsel %vm1007_vm1, %v3383_v10, -inf }
 0x32c   :  { %v1600_v18 = vrot.slane %v1599_v11, 4  ;;  %1027 = vmax.xlane.f32.xlu0 %v1026_v14  ;;  %v1606_v19 = vmax.f32 %v1026_v14, %v1029_v17  ;;  %v1590_v20 = vrot.slane %v1589_v12, 1  ;;  %v1596_v23 = vmax.f32 %v1594_v3, %v1595_v9 }
 0x32e   :  { %v1601_v24 = vmax.f32 %v1599_v11, %v1600_v18  ;;  %v1607_v29 = vrot.slane %v1606_v19, 4  ;;  %1030 = vmax.xlane.f32.xlu1 %v1029_v17  ;;  %v3389_v30 = vpop.f32.mrb[32].mxu0  ;;  %v1597_v33 = vrot.slane %v1596_v23, 1  ;;  %v3393_v37 = vmax.f32 %v1589_v12, %v1590_v20 }
 0x32f   :  { %v2663_v34 = vpop.f32.mrb[33].mxu0  ;;  %v1032_v35 = vsel %vm1007_vm1, %v3389_v30, -inf }
 0x330   :  { %v1602_v40 = vrot.slane %v1601_v24, 2  ;;  %v1608_v41 = vmax.f32 %v1606_v19, %v1607_v29  ;;  %v3395_v16 = vpop.f32.mrb[32].mxu1  ;;  %1033 = vmax.xlane.f32.xlu0 %v1032_v35  ;;  %v3397_v42 = vpop.f32.mrb[34].mxu0  ;;  %v3401_v45 = vmax.f32 %v1596_v23, %v1597_v33  ;;  %v1641_v51 = vsel %vm1007_vm1, %v3393_v37, -inf }
 0x331   :  { %v2664_v43 = vpop.f32.mrb[35].mxu0  ;;  %v2669_v44 = vpop.f32.mrb[33].mxu1  ;;  %v1035_v15 = vsel %vm1007_vm1, %v3397_v42, -inf  ;;  %v1038_v52 = vsel %vm1007_vm1, %v3395_v16, -inf }
 0x332   :  { %v1609_v39 = vrot.slane %v1608_v41, 2  ;;  %v3403_v36 = vpop.f32.mrb[34].mxu1  ;;  %1036 = vmax.xlane.f32.xlu1 %v1035_v15  ;;  %v1613_v46 = vmax.f32 %v1032_v35, %v1035_v15  ;;  %v1603_v47 = vmax.f32 %v1601_v24, %v1602_v40  ;;  %v1644_v59 = vsel %vm1007_vm1, %v3401_v45, -inf }
 0x333   :  { %v2670_v50 = vpop.f32.mrb[35].mxu1  ;;  %v1041_v53 = vsel %vm1007_vm1, %v3403_v36, -inf }
 0x334   :  { %v1614_v55 = vrot.slane %v1613_v46, 4  ;;  %1642 = vmax.xlane.f32.xlu0 %v1641_v51  ;;  %v1620_v56 = vmax.f32 %v1038_v52, %v1041_v53  ;;  %v1604_v57 = vrot.slane %v1603_v47, 1  ;;  %v1610_v58 = vmax.f32 %v1608_v41, %v1609_v39 }
 0x336   :  { %v1615_v60 = vmax.f32 %v1613_v46, %v1614_v55  ;;  %1645 = vmax.xlane.f32.xlu1 %v1644_v59  ;;  %v3413_v61 = vpop.f32.mrb[36].mxu0  ;;  %v1621_v63 = vrot.slane %v1620_v56, 4  ;;  %v1611_v0 = vrot.slane %v1610_v58, 1  ;;  %v3415_v3 = vmax.f32 %v1603_v47, %v1604_v57 }
 0x337   :  { %v2675_v1 = vpop.f32.mrb[37].mxu0  ;;  %v1044_v14 = vsel %vm1007_vm1, %v3413_v61, -inf }
 0x338   :  { %v1616_v6 = vrot.slane %v1615_v60, 2  ;;  %v3417_v7 = vpop.f32.mrb[36].mxu1  ;;  %1039 = vmax.xlane.f32.xlu0 %v1038_v52  ;;  %v3419_v8 = vpop.f32.mrb[38].mxu0  ;;  %v1622_v9 = vmax.f32 %v1620_v56, %v1621_v63  ;;  %v3421_v13 = vmax.f32 %v1610_v58, %v1611_v0  ;;  %v1647_v29 = vsel %vm1007_vm1, %v3415_v3, -inf }
 0x339   :  { %v2676_v11 = vpop.f32.mrb[39].mxu0  ;;  %v2681_v12 = vpop.f32.mrb[37].mxu1  ;;  %v1047_v17 = vsel %vm1007_vm1, %v3419_v8, -inf  ;;  %v1050_v33 = vsel %vm1007_vm1, %v3417_v7, -inf  ;;  %v1228_v58 = vsel %vm1179_vm2, %v3226_v22, 0 }
 0x33a   :  { %v3427_v18 = vpop.f32.mrb[38].mxu1  ;;  %v1623_v19 = vrot.slane %v1622_v9, 2  ;;  %1042 = vmax.xlane.f32.xlu1 %v1041_v53  ;;  %v1627_v20 = vmax.f32 %v1044_v14, %v1047_v17  ;;  %v1617_v23 = vmax.f32 %v1615_v60, %v1616_v6  ;;  %v1650_v44 = vsel %vm1007_vm1, %v3421_v13, -inf  ;;  %2690 = vmatpush3.bf16.msra.mxu1 %v1228_v58 }
 0x33b   :  { %v2682_v24 = vpop.f32.mrb[39].mxu1  ;;  %v1053_v34 = vsel %vm1007_vm1, %v3427_v18, -inf  ;;  %v1181_v53 = vsel %vm1179_vm2, %v3224_v21, 0  ;;  %2701 = vmatprep.subr.bf16.mxu1 %v3104_v2 }
 0x33c   :  { %1648 = vmax.xlane.f32.xlu0 %v1647_v29  ;;  %v1628_v35 = vrot.slane %v1627_v20, 4  ;;  %v1618_v40 = vrot.slane %v1617_v23, 1  ;;  %v1624_v41 = vmax.f32 %v1622_v9, %v1623_v19  ;;  %v1634_v43 = vmax.f32 %v1050_v33, %v1053_v34  ;;  %2684 = vmatpush3.bf16.msra.mxu0 %v1181_v53 }
 0x33d   :  { %2695 = vmatprep.subr.bf16.mxu0 %v3104_v2 }
 0x33e   :  { %1651 = vmax.xlane.f32.xlu1 %v1650_v44  ;;  %v1629_v15 = vmax.f32 %v1627_v20, %v1628_v35  ;;  %v1625_v39 = vrot.slane %v1624_v41, 1  ;;  %v1635_v46 = vrot.slane %v1634_v43, 4  ;;  %v3437_v47 = vmax.f32 %v1617_v23, %v1618_v40 }
 0x340   :  { %1045 = vmax.xlane.f32.xlu0 %v1044_v14  ;;  %v1630_v50 = vrot.slane %v1629_v15, 2  ;;  %v1636_v51 = vmax.f32 %v1634_v43, %v1635_v46  ;;  %v3439_v52 = vmax.f32 %v1624_v41, %v1625_v39  ;;  %v1653_v57 = vsel %vm1007_vm1, %v3437_v47, -inf }
 0x342   :  { %1048 = vmax.xlane.f32.xlu1 %v1047_v17  ;;  %v1637_v55 = vrot.slane %v1636_v51, 2  ;;  %v1631_v56 = vmax.f32 %v1629_v15, %v1630_v50  ;;  %v1656_v63 = vsel %vm1007_vm1, %v3439_v52, -inf }
 0x344   :  { %1654 = vmax.xlane.f32.xlu0 %v1653_v57  ;;  %v1632_v59 = vrot.slane %v1631_v56, 1  ;;  %v1638_v60 = vmax.f32 %v1636_v51, %v1637_v55 }
 0x346   :  { %1657 = vmax.xlane.f32.xlu1 %v1656_v63  ;;  %v1639_v21 = vrot.slane %v1638_v60, 1  ;;  %v3451_v0 = vmax.f32 %v1631_v56, %v1632_v59 }
 0x348   :  { %1051 = vmax.xlane.f32.xlu0 %v1050_v33  ;;  %v3453_v1 = vmax.f32 %v1638_v60, %v1639_v21  ;;  %v1659_v22 = vsel %vm1007_vm1, %v3451_v0, -inf }
 0x34a   :  { %1054 = vmax.xlane.f32.xlu1 %v1053_v34  ;;  %v1662_v6 = vsel %vm1007_vm1, %v3453_v1, -inf }
 0x34c   :  { %1660 = vmax.xlane.f32.xlu0 %v1659_v22 }
 0x34e   :  { %1663 = vmax.xlane.f32.xlu1 %v1662_v6  ;;  %v1322_v6 = vsel %vm1179_vm2, %v3232_v26, 0 }
 0x3ad   :  { %v1010_v9 = vpop.xlane.xlu0 %1009 }
 0x3ae   :  { %v1056_v11 = vsub.f32 %v3357_v38, %v1010_v9 }
 0x3af   :  { %v3460_v12 = vpop.xlane.xlu1 %1015 }
 0x3b0   :  { %v1058_v14 = vsub.f32 %v3361_v48, %v3460_v12  ;;  %v1072_v17 = vmul.f32 1.442695, %v1056_v11 }
 0x3b1   :  { %v1013_v19 = vpop.xlane.xlu0 %1012 }
 0x3b2   :  { %v1057_v20 = vsub.f32 %v3363_v49, %v1013_v19  ;;  %v1076_v23 = vmul.f32 1.442695, %v1058_v14  ;;  %2820 = vpow2.f32 %v1072_v17 }
 0x3b3   :  { %v3465_v24 = vpop.xlane.xlu1 %1018 }
 0x3b4   :  { %v1074_v29 = vmul.f32 1.442695, %v1057_v20  ;;  %v1059_v33 = vsub.f32 %v3369_v54, %v3465_v24 }
 0x3b5   :  { %v3469_v34 = vpop.xlane.xlu0 %1021 }
 0x3b6   :  { %2822 = vpow2.f32 %v1074_v29  ;;  %v1078_v38 = vmul.f32 1.442695, %v1059_v33  ;;  %v1060_v35 = vsub.f32 %v3373_v62, %v3469_v34 }
 0x3b7   :  { %2824 = vpow2.f32 %v1076_v23  ;;  %v3473_v48 = vpop.xlane.xlu1 %1024 }
 0x3b8   :  { %2826 = vpow2.f32 %v1078_v38  ;;  %v1080_v49 = vmul.f32 1.442695, %v1060_v35  ;;  %v1061_v40 = vsub.f32 %v3379_v5, %v3473_v48 }
 0x3b9   :  { %v3477_v41 = vpop.xlane.xlu0 %1027 }
 0x3ba   :  { %v1082_v43 = vmul.f32 1.442695, %v1061_v40  ;;  %v1062_v54 = vsub.f32 %v3377_v4, %v3477_v41  ;;  %2828 = vpow2.f32 %v1080_v49  ;;  %v1369_v40 = vsel %vm1179_vm2, %v3234_v27, 0 }
 0x3bb   :  { %v3481_v44 = vpop.xlane.xlu1 %1030  ;;  %v1416_v27 = vsel %vm1179_vm2, %v3236_v28, 0 }
 0x3bc   :  { %2830 = vpow2.f32 %v1082_v43  ;;  %v1084_v15 = vmul.f32 1.442695, %v1062_v54  ;;  %v1063_v62 = vsub.f32 %v3383_v10, %v3481_v44  ;;  %v3489_v50 = vpop.eup %2820 }
 0x3bd   :  { %v3485_v39 = vpop.xlane.xlu0 %1033 }
 0x3be   :  { %v1086_v46 = vmul.f32 1.442695, %v1063_v62  ;;  %v1064_v5 = vsub.f32 %v3389_v30, %v3485_v39  ;;  %2832 = vpow2.f32 %v1084_v15  ;;  %v1275_v30 = vsel %vm1179_vm2, %v3230_v25, 0 }
 0x3bf   :  { %v3491_v51 = vpop.xlane.xlu1 %1036 }
 0x3c0   :  { %v3493_v4 = vpop.eup %2822  ;;  %2834 = vpow2.f32 %v1086_v46  ;;  %v1088_v53 = vmul.f32 1.442695, %v1064_v5  ;;  %v1065_v55 = vsub.f32 %v3397_v42, %v3491_v51 }
 0x3c1   :  { %v3497_v56 = vpop.eup %2824  ;;  %v1643_v10 = vpop.xlane.xlu0 %1642  ;;  %v1168_v57 = vpack.c.bf16 %v3493_v4, %v3489_v50 }
 0x3c2   :  { %v3503_v58 = vpop.eup %2826  ;;  %v1090_v59 = vmul.f32 1.442695, %v1065_v55  ;;  %v1665_v60 = vsub.f32 %v1010_v9, %v1643_v10  ;;  %v1666_v63 = vsub.f32 %v1013_v19, %v1643_v10  ;;  %2836 = vpow2.f32 %v1088_v53 }
 0x3c3   :  { %v1713_v21 = vsub.f32 %v1643_v10, %v3393_v37  ;;  %2686 = vmatmul.mubr.msk.bf16.vlgmr.msra.gmra.mrb[40].mxu0 %vm1007_vm1, %v1168_v57  ;;  %v1646_v42 = vpop.xlane.xlu1 %1645  ;;  %v1169_v22 = vpack.c.bf16 %v3503_v58, %v3497_v56 }
 0x3c4   :  { %2838 = vpow2.f32 %v1090_v59  ;;  %v1681_v11 = vmul.f32 1.442695, %v1665_v60  ;;  %v1683_v25 = vmul.f32 1.442695, %v1666_v63  ;;  %v1667_v14 = vsub.f32 %v3460_v12, %v1646_v42  ;;  %2696 = vmatpush3.bf16.msra.mxu0 %v1275_v30  ;;  %2697 = vmatprep.mubr.msk.bf16.mxu0 %vm3105_vm0, %v3104_v2  ;;  %v3514_v9 = vpop.eup %2828 }
 0x3c5   :  { %v1721_v37 = vmul.f32 1.442695, %v1713_v21  ;;  %v1668_v17 = vsub.f32 %v3465_v24, %v1646_v42  ;;  %v1714_v19 = vsub.f32 %v1646_v42, %v3401_v45  ;;  %2692 = vmatmul.mubr.msk.bf16.vlgmr.msra.gmra.mrb[40].mxu1 %vm1007_vm1, %v1169_v22  ;;  %v3519_v20 = vpop.xlane.xlu0 %1039  ;;  %2707 = vmatprep.subr.bf16.mxu0 %v3104_v2 }
 0x3c6   :  { %v3522_v26 = vpop.eup %2830  ;;  %2840 = vpow2.f32 %v1681_v11  ;;  %v1685_v12 = vmul.f32 1.442695, %v1667_v14  ;;  %v1066_v23 = vsub.f32 %v3395_v16, %v3519_v20  ;;  %2702 = vmatpush3.bf16.msra.mxu1 %v1322_v6  ;;  %2703 = vmatprep.mubr.msk.bf16.mxu1 %vm3105_vm0, %v3104_v2  ;;  %v3578_v14 = vsel %vm1179_vm2, %v3244_v32, 0 }
 0x3c7   :  { %2842 = vpow2.f32 %v1683_v25  ;;  %v1687_v24 = vmul.f32 1.442695, %v1668_v17  ;;  %v1723_v45 = vmul.f32 1.442695, %v1714_v19  ;;  %v3528_v29 = vpop.xlane.xlu1 %1042  ;;  %v1170_v33 = vpack.c.bf16 %v3522_v26, %v3514_v9  ;;  %2713 = vmatprep.subr.bf16.mxu1 %v3104_v2 }
 0x3c8   :  { %2844 = vpow2.f32 %v1721_v37  ;;  %v1092_v38 = vmul.f32 1.442695, %v1066_v23  ;;  %v1067_v35 = vsub.f32 %v3403_v36, %v3528_v29  ;;  %v3535_v16 = vpop.eup %2832  ;;  %v1463_v25 = vsel %vm1179_vm2, %v3242_v31, 0 }
 0x3c9   :  { %2846 = vpow2.f32 %v1685_v12  ;;  %v1649_v49 = vpop.xlane.xlu0 %1648 }
 0x3ca   :  { %v3539_v43 = vpop.eup %2834  ;;  %2848 = vpow2.f32 %v1687_v24  ;;  %v1094_v54 = vmul.f32 1.442695, %v1067_v35  ;;  %v1669_v15 = vsub.f32 %v3469_v34, %v1649_v49  ;;  %v1670_v62 = vsub.f32 %v3473_v48, %v1649_v49 }
 0x3cb   :  { %2850 = vpow2.f32 %v1723_v45  ;;  %v1715_v46 = vsub.f32 %v1649_v49, %v3415_v3  ;;  %2698 = vmatmul.mubr.msk.bf16.vlgmr.msra.gmra.mrb[44].mxu0 %vm1007_vm1, %v1170_v33  ;;  %v1652_v36 = vpop.xlane.xlu1 %1651  ;;  %v1171_v5 = vpack.c.bf16 %v3539_v43, %v3535_v16 }
 0x3cc   :  { %2852 = vpow2.f32 %v1092_v38  ;;  %v1689_v53 = vmul.f32 1.442695, %v1669_v15  ;;  %v1691_v55 = vmul.f32 1.442695, %v1670_v62  ;;  %v1671_v10 = vsub.f32 %v3477_v41, %v1652_v36  ;;  %2708 = vmatpush3.bf16.msra.mxu0 %v1369_v40  ;;  %2709 = vmatprep.mubr.msk.bf16.mxu0 %vm3105_vm0, %v3104_v2  ;;  %v3552_v34 = vpop.eup %2836 }
 0x3cd   :  { %2854 = vpow2.f32 %v1094_v54  ;;  %v1725_v3 = vmul.f32 1.442695, %v1715_v46  ;;  %v1672_v48 = vsub.f32 %v3481_v44, %v1652_v36  ;;  %v1716_v57 = vsub.f32 %v1652_v36, %v3421_v13  ;;  %2704 = vmatmul.mubr.msk.bf16.vlgmr.msra.gmra.mrb[44].mxu1 %vm1007_vm1, %v1171_v5  ;;  %v3557_v28 = vpop.xlane.xlu0 %1045  ;;  %2719 = vmatprep.subr.bf16.mxu0 %v3104_v2 }
 0x3ce   :  { %v3560_v30 = vpop.eup %2838  ;;  %2856 = vpow2.f32 %v1689_v53  ;;  %v1693_v41 = vmul.f32 1.442695, %v1671_v10  ;;  %v1068_v59 = vsub.f32 %v3413_v61, %v3557_v28  ;;  %2714 = vmatpush3.bf16.msra.mxu1 %v1416_v27  ;;  %2715 = vmatprep.mubr.msk.bf16.mxu1 %vm3105_vm0, %v3104_v2 }
 0x3cf   :  { %2858 = vpow2.f32 %v1691_v55  ;;  %v1695_v44 = vmul.f32 1.442695, %v1672_v48  ;;  %v1727_v13 = vmul.f32 1.442695, %v1716_v57  ;;  %v3566_v60 = vpop.xlane.xlu1 %1048  ;;  %v1172_v63 = vpack.c.bf16 %v3560_v30, %v3552_v34  ;;  %2725 = vmatprep.subr.bf16.mxu1 %v3104_v2 }
 0x3d0   :  { %v2841_v21 = vpop.eup %2840  ;;  %2860 = vpow2.f32 %v1725_v3  ;;  %v1096_v42 = vmul.f32 1.442695, %v1068_v59  ;;  %v1069_v61 = vsub.f32 %v3419_v8, %v3566_v60 }
 0x3d1   :  { %v2843_v22 = vpop.eup %2842  ;;  %2862 = vpow2.f32 %v1693_v41  ;;  %v1655_v6 = vpop.xlane.xlu0 %1654  ;;  %v1737_v11 = vmul.f32 %v2841_v21, %v3489_v50 }
 0x3d2   :  { %v2845_v37 = vpop.eup %2844  ;;  %2864 = vpow2.f32 %v1695_v44  ;;  %v1098_v17 = vmul.f32 1.442695, %v1069_v61  ;;  %v1673_v19 = vsub.f32 %v3485_v39, %v1655_v6  ;;  %v1674_v12 = vsub.f32 %v3491_v51, %v1655_v6 }
 0x3d3   :  { %v2847_v8 = vpop.eup %2846  ;;  %2866 = vpow2.f32 %v1727_v13  ;;  %v1717_v23 = vsub.f32 %v1655_v6, %v3437_v47  ;;  %2710 = vmatmul.mubr.msk.bf16.vlgmr.msra.gmra.mrb[48].mxu0 %vm1007_vm1, %v1172_v63  ;;  %v1658_v24 = vpop.xlane.xlu1 %1657  ;;  %v1738_v31 = vmul.f32 %v2843_v22, %v3493_v4  ;;  %v1753_v45 = vmul.f32 %v2845_v37, %v1737_v11 }
 0x3d4   :  { %v2849_v33 = vpop.eup %2848  ;;  %2868 = vpow2.f32 %v1096_v42  ;;  %v1697_v32 = vmul.f32 1.442695, %v1673_v19  ;;  %v1699_v38 = vmul.f32 1.442695, %v1674_v12  ;;  %v1675_v35 = vsub.f32 %v3519_v20, %v1658_v24  ;;  %2720 = vmatpush3.bf16.msra.mxu0 %v1463_v25  ;;  %2721 = vmatprep.mubr.msk.bf16.mxu0 %vm3105_vm0, %v3104_v2 }
 0x3d5   :  { %v2851_v39 = vpop.eup %2850  ;;  %2870 = vpow2.f32 %v1098_v17  ;;  %v1729_v51 = vmul.f32 1.442695, %v1717_v23  ;;  %v1676_v47 = vsub.f32 %v3528_v29, %v1658_v24  ;;  %v1718_v49 = vsub.f32 %v1658_v24, %v3439_v52  ;;  %v3590_v40 = vpop.xlane.xlu0 %1051  ;;  %2731 = vmatprep.subr.bf16.mxu0 %v3104_v2 }
 0x3d6   :  { %v3593_v54 = vpop.eup %2852  ;;  %2872 = vpow2.f32 %v1697_v32  ;;  %v1701_v15 = vmul.f32 1.442695, %v1675_v35  ;;  %v1070_v20 = vsub.f32 %v3417_v7, %v3590_v40  ;;  %v1754_v62 = vmul.f32 %v2845_v37, %v1738_v31 }
 0x3d7   :  { %v3597_v46 = vpop.eup %2854  ;;  %2874 = vpow2.f32 %v1699_v38  ;;  %v1703_v36 = vmul.f32 1.442695, %v1676_v47  ;;  %v1731_v5 = vmul.f32 1.442695, %v1718_v49  ;;  %v1055_v29 = vpop.xlane.xlu1 %1054  ;;  %v1769_v52 = vsel %vm1007_vm1, %v1753_v45, 0.0 }
 0x3d8   :  { %v2857_v27 = vpop.eup %2856  ;;  %2876 = vpow2.f32 %v1729_v51  ;;  %v1100_v53 = vmul.f32 1.442695, %v1070_v20  ;;  %v1071_v55 = vsub.f32 %v3427_v18, %v1055_v29  ;;  %v1770_v10 = vsel %vm1007_vm1, %v1754_v62, 0.0 }
 0x3d9   :  { %v2859_v3 = vpop.eup %2858  ;;  %2878 = vpow2.f32 %v1701_v15  ;;  %v3602_v48 = vadd.f32 %v1770_v10, %v1769_v52  ;;  %v1849_v7 = vpack.c.bf16 %v1754_v62, %v1753_v45  ;;  %v1173_v57 = vpack.c.bf16 %v3597_v46, %v3593_v54  ;;  %v1661_v41 = vpop.xlane.xlu0 %1660 }
 0x3da   :  { %v2861_v59 = vpop.eup %2860  ;;  %2880 = vpow2.f32 %v1703_v36  ;;  %v1102_v44 = vmul.f32 1.442695, %v1071_v55  ;;  %v1739_v13 = vmul.f32 %v2847_v8, %v3497_v56  ;;  %v1740_v63 = vmul.f32 %v2849_v33, %v3503_v58 }
 0x3db   :  { %v2863_v21 = vpop.eup %2862  ;;  %2882 = vpow2.f32 %v1731_v5  ;;  %1857 = vxpose.xlu0.c.b16.start.end [1/1] (short) (narrow) %v1849_v7, 16  ;;  %2716 = vmatmul.mubr.msk.bf16.vlgmr.msra.gmra.mrb[48].mxu1 %vm1007_vm1, %v1173_v57  ;;  %v1677_v18 = vsub.f32 %v3557_v28, %v1661_v41  ;;  %v1678_v42 = vsub.f32 %v3566_v60, %v1661_v41  ;;  %v1719_v11 = vsub.f32 %v1661_v41, %v3451_v0  ;;  %v1664_v25 = vpop.xlane.xlu1 %1663 }
 0x3dc   :  { %v2865_v61 = vpop.eup %2864  ;;  %2884 = vpow2.f32 %v1100_v53  ;;  %v1755_v22 = vmul.f32 %v2851_v39, %v1739_v13  ;;  %v1756_v6 = vmul.f32 %v2851_v39, %v1740_v63  ;;  %2726 = vmatpush3.bf16.msra.mxu1 %v3578_v14  ;;  %2727 = vmatprep.mubr.msk.bf16.mxu1 %vm3105_vm0, %v3104_v2  ;;  %v1679_v24 = vsub.f32 %v3590_v40, %v1664_v25 }
 0x3dd   :  { %v2867_v37 = vpop.eup %2866  ;;  %2886 = vpow2.f32 %v1102_v44  ;;  %v1705_v17 = vmul.f32 1.442695, %v1677_v18  ;;  %v1707_v19 = vmul.f32 1.442695, %v1678_v42  ;;  %2737 = vmatprep.subr.bf16.mxu1 %v3104_v2  ;;  %v1733_v0 = vmul.f32 1.442695, %v1719_v11 }
 0x3de   :  { %v3616_v28 = vpop.eup %2868  ;;  %v1778_v60 = vsel %vm1007_vm1, %v1755_v22, 0.0  ;;  %v1779_v12 = vsel %vm1007_vm1, %v1756_v6, 0.0  ;;  %v1850_v8 = vpack.c.bf16 %v1756_v6, %v1755_v22  ;;  %v1680_v45 = vsub.f32 %v1055_v29, %v1664_v25  ;;  %v2948_v42 = vld [vmem:[#allocation2] sm:$0xff]  }
 0x3df   :  { %v3620_v23 = vpop.eup %2870  ;;  %v3622_v14 = vadd.f32 %v1779_v12, %v1778_v60  ;;  %2888 = vpow2.f32 %v1705_v17  ;;  %v1720_v33 = vsub.f32 %v1664_v25, %v3453_v1  ;;  %v1741_v32 = vmul.f32 %v2857_v27, %v3514_v9 }
 0x3e0   :  { %v2873_v31 = vpop.eup %2872  ;;  %1917 = vxpose.xlu1.c.b16.start.end [1/1] (short) (narrow) %v1850_v8, 16  ;;  %2890 = vpow2.f32 %v1707_v19  ;;  %v1709_v35 = vmul.f32 1.442695, %v1679_v24  ;;  %v1711_v51 = vmul.f32 1.442695, %v1680_v45  ;;  %v1742_v47 = vmul.f32 %v2859_v3, %v3522_v26 }
 0x3e1   :  { %v2875_v38 = vpop.eup %2874  ;;  %2892 = vpow2.f32 %v1733_v0  ;;  %v1757_v49 = vmul.f32 %v2861_v59, %v1741_v32  ;;  %v1735_v20 = vmul.f32 1.442695, %v1720_v33  ;;  %v1743_v40 = vmul.f32 %v2863_v21, %v3535_v16 }
 0x3e2   :  { %v2877_v39 = vpop.eup %2876  ;;  %2894 = vpow2.f32 %v1709_v35  ;;  %v1758_v36 = vmul.f32 %v2861_v59, %v1742_v47  ;;  %v1744_v5 = vmul.f32 %v2865_v61, %v3539_v43  ;;  %v1174_v27 = vpack.c.bf16 %v3620_v23, %v3616_v28 }
 0x3e3   :  { %v2879_v15 = vpop.eup %2878  ;;  %2896 = vpow2.f32 %v1711_v51  ;;  %v1787_v1 = vsel %vm1007_vm1, %v1757_v49, 0.0  ;;  %v1759_v52 = vmul.f32 %v2867_v37, %v1743_v40  ;;  %v1745_v7 = vmul.f32 %v2873_v31, %v3552_v34 }
 0x3e4   :  { %v2881_v62 = vpop.eup %2880  ;;  %v1788_v55 = vsel %vm1007_vm1, %v1758_v36, 0.0  ;;  %v1851_v10 = vpack.c.bf16 %v1758_v36, %v1757_v49  ;;  %v1760_v3 = vmul.f32 %v2867_v37, %v1744_v5  ;;  %2898 = vpow2.f32 %v1735_v20  ;;  %2722 = vmatmul.mubr.msk.bf16.vlgmr.msra.gmra.mrb[52].mxu0 %vm1007_vm1, %v1174_v27 }
 0x3e5   :  { %v2883_v29 = vpop.eup %2882  ;;  %v3639_v41 = vadd.f32 %v1788_v55, %v1787_v1  ;;  %v1796_v59 = vsel %vm1007_vm1, %v1759_v52, 0.0  ;;  %v1746_v44 = vmul.f32 %v2875_v38, %v3560_v30  ;;  %v1761_v21 = vmul.f32 %v2877_v39, %v1745_v7  ;;  %2732 = vmatpush3.bf16.msra.mxu0 %v2948_v42  ;;  %2733 = vmatprep.mubr.msk.bf16.mxu0 %vm3105_vm0, %v3104_v2  ;;  %v2949_v38 = vld [vmem:[#allocation2 + $0x8] sm:$0xff]  }
 0x3e6   :  { %v3633_v53 = vpop.eup %2884  ;;  %1976 = vxpose.xlu0.c.b16.start.end [1/1] (short) (narrow) %v1851_v10, 16  ;;  %v1797_v13 = vsel %vm1007_vm1, %v1760_v3, 0.0  ;;  %v1852_v63 = vpack.c.bf16 %v1760_v3, %v1759_v52  ;;  %v1747_v18 = vmul.f32 %v2879_v15, %v3593_v54  ;;  %2743 = vmatprep.subr.bf16.mxu0 %v3104_v2  ;;  %v1748_v37 = vmul.f32 %v2881_v62, %v3597_v46 }
 0x3e7   :  { %v3637_v57 = vpop.eup %2886  ;;  %v3646_v22 = vadd.f32 %v1797_v13, %v1796_v59  ;;  %v1762_v6 = vmul.f32 %v2877_v39, %v1746_v44  ;;  %v1805_v25 = vsel %vm1007_vm1, %v1761_v21, 0.0  ;;  %v1104_v59 = vsel %vm1007_vm1, %v3489_v50, 0.0 }
 0x3e8   :  { %2035 = vxpose.xlu1.c.b16.start.end [1/1] (short) (narrow) %v1852_v63, 16  ;;  %v1763_v17 = vmul.f32 %v2883_v29, %v1747_v18  ;;  %v1175_v19 = vpack.c.bf16 %v3637_v57, %v3633_v53  ;;  %v1764_v24 = vmul.f32 %v2883_v29, %v1748_v37  ;;  %v1107_v44 = vsel %vm1007_vm1, %v3493_v4, 0.0 }
 0x3e9   :  { %v2889_v61 = vpop.eup %2888  ;;  %v1806_v60 = vsel %vm1007_vm1, %v1762_v6, 0.0  ;;  %v1853_v12 = vpack.c.bf16 %v1762_v6, %v1761_v21  ;;  %v1110_v13 = vsel %vm1007_vm1, %v3497_v56, 0.0  ;;  %v1113_v63 = vsel %vm1007_vm1, %v3503_v58, 0.0 }
 0x3ea   :  { %v2891_v11 = vpop.eup %2890  ;;  %v3656_v0 = vadd.f32 %v1806_v60, %v1805_v25  ;;  %v1814_v31 = vsel %vm1007_vm1, %v1763_v17, 0.0  ;;  %2728 = vmatmul.mubr.msk.bf16.vlgmr.msra.gmra.mrb[52].mxu1 %vm1007_vm1, %v1175_v19  ;;  %v1749_v45 = vmul.f32 %v2889_v61, %v3616_v28  ;;  %v1815_v39 = vsel %vm1007_vm1, %v1764_v24, 0.0 }
 0x3eb   :  { %v2893_v8 = vpop.eup %2892  ;;  %2094 = vxpose.xlu0.c.b16.start.end [1/1] (short) (narrow) %v1853_v12, 16  ;;  %v1750_v32 = vmul.f32 %v2891_v11, %v3620_v23  ;;  %2738 = vmatpush3.bf16.msra.mxu1 %v2949_v38  ;;  %v1854_v51 = vpack.c.bf16 %v1764_v24, %v1763_v17  ;;  %v3666_v49 = vadd.f32 %v1815_v39, %v1814_v31  ;;  %v1116_v21 = vsel %vm1007_vm1, %v3514_v9, 0.0 }
 0x3ec   :  { %v2895_v33 = vpop.eup %2894  ;;  %v1765_v47 = vmul.f32 %v2893_v8, %v1749_v45  ;;  %2739 = vmatprep.mubr.msk.bf16.mxu1 %vm3105_vm0, %v3104_v2  ;;  %2749 = vmatprep.subr.bf16.mxu1 %v3104_v2  ;;  %v1119_v50 = vsel %vm1007_vm1, %v3522_v26, 0.0  ;;  %v1122_v4 = vsel %vm1007_vm1, %v3535_v16, 0.0  ;;  %v1781_v18 = vrot.slane %v3622_v14, 4 }
 0x3ed   :  { %v2897_v35 = vpop.eup %2896  ;;  %v1766_v15 = vmul.f32 %v2893_v8, %v1750_v32  ;;  %2153 = vxpose.xlu1.c.b16.start.end [1/1] (short) (narrow) %v1854_v51, 16  ;;  %v1751_v40 = vmul.f32 %v2895_v33, %v3633_v53  ;;  %v1125_v56 = vsel %vm1007_vm1, %v3539_v43, 0.0  ;;  %v1772_v58 = vrot.slane %v3602_v48, 4 }
 0x3ee   :  { %v1823_v20 = vsel %vm1007_vm1, %v1765_v47, 0.0  ;;  %v1752_v62 = vmul.f32 %v2897_v35, %v3637_v57  ;;  %v2899_v36 = vpop.eup %2898  ;;  %v1128_v9 = vsel %vm1007_vm1, %v3552_v34, 0.0  ;;  %v1782_v42 = vadd.f32 %v1781_v18, %v3622_v14 }
 0x3ef   :  { %v1824_v1 = vsel %vm1007_vm1, %v1766_v15, 0.0  ;;  %v1855_v5 = vpack.c.bf16 %v1766_v15, %v1765_v47  ;;  %v1767_v52 = vmul.f32 %v2899_v36, %v1751_v40  ;;  %v1790_v26 = vrot.slane %v3639_v41, 4 }
 0x3f0   :  { %v1825_v29 = vadd.f32 %v1824_v1, %v1823_v20  ;;  %v1768_v27 = vmul.f32 %v2899_v36, %v1752_v62  ;;  %v1131_v16 = vsel %vm1007_vm1, %v3560_v30, 0.0  ;;  %v1773_v61 = vadd.f32 %v1772_v58, %v3602_v48 }
 0x3f1   :  { %2212 = vxpose.xlu0.c.b16.start.end [1/1] (short) (narrow) %v1855_v5, 16  ;;  %v1832_v55 = vsel %vm1007_vm1, %v1767_v52, 0.0  ;;  %v1808_v6 = vrot.slane %v3656_v0, 4  ;;  %v1134_v43 = vsel %vm1007_vm1, %v3593_v54, 0.0  ;;  %v1799_v11 = vrot.slane %v3646_v22, 4 }
 0x3f2   :  { %v1833_v10 = vsel %vm1007_vm1, %v1768_v27, 0.0  ;;  %v1856_v3 = vpack.c.bf16 %v1768_v27, %v1767_v52  ;;  %v1783_v34 = vrot.slane %v1782_v42, 2  ;;  %v1791_v25 = vadd.f32 %v1790_v26, %v3639_v41  ;;  %v2951_v26 = vld [vmem:[#allocation2 + $0x18] sm:$0xff]  }
 0x3f3   :  { %v3674_v7 = vadd.f32 %v1833_v10, %v1832_v55  ;;  %v1137_v14 = vsel %vm1007_vm1, %v3597_v46, 0.0  ;;  %v1774_v37 = vrot.slane %v1773_v61, 2  ;;  %v1809_v30 = vadd.f32 %v1808_v6, %v3656_v0  ;;  %v2952_v6 = vld [vmem:[#allocation2 + $0x20] sm:$0xff]  }
 0x3f4   :  { %2271 = vxpose.xlu1.c.b16.start.end [1/1] (short) (narrow) %v1856_v3, 16  ;;  %v1826_v17 = vrot.slane %v1825_v29, 4  ;;  %v1140_v48 = vsel %vm1007_vm1, %v3616_v28, 0.0  ;;  %v1800_v19 = vadd.f32 %v1799_v11, %v3646_v22  ;;  %v1784_v54 = vadd.f32 %v1783_v34, %v1782_v42 }
 0x3f5   :  { %v1792_v60 = vrot.slane %v1791_v25, 2  ;;  %v1817_v12 = vrot.slane %v3666_v49, 4  ;;  %v1143_v41 = vsel %vm1007_vm1, %v3620_v23, 0.0  ;;  %v1775_v8 = vadd.f32 %v1774_v37, %v1773_v61 }
 0x3f6   :  { %v1810_v46 = vrot.slane %v1809_v30, 2  ;;  %v1827_v24 = vadd.f32 %v1826_v17, %v1825_v29  ;;  %v1146_v0 = vsel %vm1007_vm1, %v3633_v53, 0.0  ;;  %v1801_v31 = vrot.slane %v1800_v19, 2 }
 0x3f7   :  { %v1785_v28 = vrot.slane %v1784_v54, 1  ;;  %v1793_v45 = vadd.f32 %v1792_v60, %v1791_v25  ;;  %v1818_v22 = vadd.f32 %v1817_v12, %v3666_v49  ;;  %v1835_v33 = vrot.slane %v3674_v7, 4  ;;  %v2954_v25 = vld [vmem:[#allocation2 + $0x30] sm:$0xff]  }
 0x3f8   :  { %v1149_v32 = vsel %vm1007_vm1, %v3637_v57, 0.0  ;;  %v1776_v38 = vrot.slane %v1775_v8, 1  ;;  %v1811_v23 = vadd.f32 %v1810_v46, %v1809_v30  ;;  %v1828_v35 = vrot.slane %v1827_v24, 2 }
 0x3f9   :  { %v1802_v39 = vadd.f32 %v1801_v31, %v1800_v19  ;;  %v1794_v51 = vrot.slane %v1793_v45, 1  ;;  %v1819_v47 = vrot.slane %v1818_v22, 2  ;;  %v1836_v53 = vadd.f32 %v1835_v33, %v3674_v7 }
 0x3fa   :  { %v1786_v15 = vadd.f32 %v1785_v28, %v1784_v54  ;;  %v1812_v20 = vrot.slane %v1811_v23, 1  ;;  %v1829_v40 = vadd.f32 %v1828_v35, %v1827_v24  ;;  %v1777_v62 = vadd.f32 %v1776_v38, %v1775_v8 }
 0x3fb   :  { %v1803_v36 = vrot.slane %v1802_v39, 1  ;;  %v1820_v49 = vadd.f32 %v1819_v47, %v1818_v22  ;;  %v1837_v1 = vrot.slane %v1836_v53, 2  ;;  %v1795_v5 = vadd.f32 %v1794_v51, %v1793_v45 }
 0x3fc   :  { %2900 = vrcp.f32 %v1786_v15  ;;  %v1830_v29 = vrot.slane %v1829_v40, 1  ;;  %v1813_v57 = vadd.f32 %v1812_v20, %v1811_v23 }
 0x3fd   :  { %2902 = vrcp.f32 %v1777_v62  ;;  %v1821_v52 = vrot.slane %v1820_v49, 1  ;;  %v1838_v27 = vadd.f32 %v1837_v1, %v1836_v53  ;;  %v1804_v55 = vadd.f32 %v1803_v36, %v1802_v39 }
 0x3fe   :  { %1105 = vadd.xlane.f32.xlu0 %v1104_v59  ;;  %2904 = vrcp.f32 %v1795_v5  ;;  %v1831_v10 = vadd.f32 %v1830_v29, %v1829_v40 }
 0x3ff   :  { %2906 = vrcp.f32 %v1813_v57  ;;  %v1839_v3 = vrot.slane %v1838_v27, 1  ;;  %v1822_v7 = vadd.f32 %v1821_v52, %v1820_v49 }
 0x400   :  { %2908 = vrcp.f32 %v1804_v55 }
 0x401   :  { %1108 = vadd.xlane.f32.xlu1 %v1107_v44  ;;  %2910 = vrcp.f32 %v1831_v10 }
 0x402   :  { %1111 = vadd.xlane.f32.xlu0 %v1110_v13  ;;  %2912 = vrcp.f32 %v1822_v7  ;;  %v1840_v13 = vadd.f32 %v1839_v3, %v1838_v27 }
 0x404   :  { %2914 = vrcp.f32 %v1840_v13 }
 0x405   :  { %1114 = vadd.xlane.f32.xlu1 %v1113_v63 }
 0x406   :  { %1117 = vadd.xlane.f32.xlu0 %v1116_v21  ;;  %v2901_v59 = vpop.eup %2900 }
 0x407   :  { %v2903_v44 = vpop.eup %2902 }
 0x408   :  { %v2905_v63 = vpop.eup %2904 }
 0x409   :  { %1120 = vadd.xlane.f32.xlu1 %v1119_v50  ;;  %v2907_v21 = vpop.eup %2906 }
 0x40a   :  { %1123 = vadd.xlane.f32.xlu0 %v1122_v4  ;;  %v2909_v50 = vpop.eup %2908 }
 0x40b   :  { %v2911_v4 = vpop.eup %2910 }
 0x40c   :  { %v2913_v18 = vpop.eup %2912 }
 0x40d   :  { %1126 = vadd.xlane.f32.xlu1 %v1125_v56 }
 0x40e   :  { %1129 = vadd.xlane.f32.xlu0 %v1128_v9  ;;  %v2915_v56 = vpop.eup %2914  ;;  %v2950_v9 = vld [vmem:[#allocation2 + $0x10] sm:$0xff]  }
 0x411   :  { %1132 = vadd.xlane.f32.xlu1 %v1131_v16 }
 0x412   :  { %1135 = vadd.xlane.f32.xlu0 %v1134_v43  ;;  %v2953_v43 = vld [vmem:[#allocation2 + $0x28] sm:$0xff]  }
 0x415   :  { %1138 = vadd.xlane.f32.xlu1 %v1137_v14  ;;  %v2955_v14 = vld [vmem:[#allocation2 + $0x38] sm:$0xff]  }
 0x416   :  { %1141 = vadd.xlane.f32.xlu0 %v1140_v48 }
 0x419   :  { %1144 = vadd.xlane.f32.xlu1 %v1143_v41 }
 0x41a   :  { %1147 = vadd.xlane.f32.xlu0 %v1146_v0 }
 0x41d   :  { %1150 = vadd.xlane.f32.xlu1 %v1149_v32 }
 0x42e   :  { %2334 = vbcast.lane.b32.xlu1 %v2901_v59, 256 }
 0x430   :  { %2331 = vbcast.lane.b32.xlu0 %v2903_v44, 256 }
 0x432   :  { %2337 = vbcast.lane.b32.xlu1 %v2905_v63, 256 }
 0x434   :  { %2343 = vbcast.lane.b32.xlu0 %v2907_v21, 256 }
 0x436   :  { %2340 = vbcast.lane.b32.xlu1 %v2909_v50, 256 }
 0x438   :  { %2349 = vbcast.lane.b32.xlu0 %v2911_v4, 256 }
 0x43a   :  { %2346 = vbcast.lane.b32.xlu1 %v2913_v18, 256 }
 0x43e   :  { %2352 = vbcast.lane.b32.xlu1 %v2915_v56, 256 }
 0x441   :  { %v1865_v58 = vpop.trf.xlu0 }
 0x442   :  { %2734 = vmatmul.mubr.msk.bf16.vlgmr.msra.gmra.mrb[56].mxu0 %vm1873_vm3, %v1865_v58 }
 0x443   :  { %2744 = vmatpush3.bf16.msra.mxu0 %v2950_v9  ;;  %2745 = vmatprep.mubr.msk.bf16.mxu0 %vm3105_vm0, %v3104_v2 }
 0x444   :  { %2755 = vmatprep.subr.bf16.mxu0 %v3104_v2 }
 0x446   :  { %v1925_v42 = vpop.trf.xlu1 }
 0x447   :  { %2740 = vmatmul.mubr.msk.bf16.vlgmr.msra.gmra.mrb[56].mxu1 %vm1873_vm3, %v1925_v42 }
 0x448   :  { %2750 = vmatpush3.bf16.msra.mxu1 %v2951_v26  ;;  %2751 = vmatprep.mubr.msk.bf16.mxu1 %vm3105_vm0, %v3104_v2 }
 0x449   :  { %2761 = vmatprep.subr.bf16.mxu1 %v3104_v2 }
 0x44c   :  { %v1984_v16 = vpop.trf.xlu0 }
 0x44d   :  { %2746 = vmatmul.mubr.msk.bf16.vlgmr.msra.gmra.mrb[60].mxu0 %vm1873_vm3, %v1984_v16 }
 0x44e   :  { %v2043_v61 = vpop.trf.xlu1  ;;  %2756 = vmatpush3.bf16.msra.mxu0 %v2952_v6  ;;  %2757 = vmatprep.mubr.msk.bf16.mxu0 %vm3105_vm0, %v3104_v2 }
 0x44f   :  { %2752 = vmatmul.mubr.msk.bf16.vlgmr.msra.gmra.mrb[60].mxu1 %vm1873_vm3, %v2043_v61  ;;  %2767 = vmatprep.subr.bf16.mxu0 %v3104_v2 }
 0x450   :  { %2762 = vmatpush3.bf16.msra.mxu1 %v2953_v43  ;;  %2763 = vmatprep.mubr.msk.bf16.mxu1 %vm3105_vm0, %v3104_v2 }
 0x451   :  { %2773 = vmatprep.subr.bf16.mxu1 %v3104_v2  ;;  %v2102_v11 = vpop.trf.xlu0 }
 0x453   :  { %v2161_v34 = vpop.trf.xlu1 }
 0x455   :  { %2758 = vmatmul.mubr.msk.bf16.vlgmr.msra.gmra.mrb[64].mxu0 %vm1873_vm3, %v2102_v11 }
 0x456   :  { %2768 = vmatpush3.bf16.msra.mxu0 %v2954_v25  ;;  %2769 = vmatprep.mubr.msk.bf16.mxu0 %vm3105_vm0, %v3104_v2 }
 0x457   :  { %2764 = vmatmul.mubr.msk.bf16.vlgmr.msra.gmra.mrb[64].mxu1 %vm1873_vm3, %v2161_v34  ;;  %v2220_v37 = vpop.trf.xlu0 }
 0x458   :  { %2774 = vmatpush3.bf16.msra.mxu1 %v2955_v14  ;;  %2775 = vmatprep.mubr.msk.bf16.mxu1 %vm3105_vm0, %v3104_v2 }
 0x45a   :  { %v2279_v30 = vpop.trf.xlu1 }
 0x45d   :  { %2770 = vmatmul.mubr.msk.bf16.vlgmr.msra.gmra.mrb[68].mxu0 %vm1873_vm3, %v2220_v37 }
 0x45f   :  { %2776 = vmatmul.mubr.msk.bf16.vlgmr.msra.gmra.mrb[68].mxu1 %vm1873_vm3, %v2279_v30 }
 0x48b   :  { %v1106_v17 = vpop.xlane.xlu0 %1105 }
 0x48c   :  { %2916 = vrcp.f32 %v1106_v17 }
 0x48e   :  { %v1109_v48 = vpop.xlane.xlu1 %1108 }
 0x48f   :  { %2918 = vrcp.f32 %v1109_v48  ;;  %v1112_v19 = vpop.xlane.xlu0 %1111 }
 0x490   :  { %2920 = vrcp.f32 %v1112_v19 }
 0x492   :  { %v1115_v54 = vpop.xlane.xlu1 %1114 }
 0x493   :  { %2922 = vrcp.f32 %v1115_v54  ;;  %v1118_v60 = vpop.xlane.xlu0 %1117 }
 0x494   :  { %2924 = vrcp.f32 %v1118_v60 }
 0x496   :  { %v1217_v12 = vpop.f32.mrb[40].mxu0  ;;  %v2917_v46 = vpop.eup %2916 }
 0x497   :  { %v2687_v41 = vpop.f32.mrb[41].mxu0  ;;  %v1121_v24 = vpop.xlane.xlu1 %1120  ;;  %v1553_v28 = vmul.f32 %v2917_v46, %v1217_v12 }
 0x498   :  { %v1220_v8 = vpop.f32.mrb[42].mxu0  ;;  %v1264_v2 = vpop.f32.mrb[40].mxu1  ;;  %2926 = vrcp.f32 %v1121_v24 }
 0x499   :  { %v2693_v0 = vpop.f32.mrb[41].mxu1  ;;  %v1124_v31 = vpop.xlane.xlu0 %1123  ;;  %1569 = vst [vmem:[#allocation10] sm:$0xff] %v1553_v28 }
 0x49a   :  { %v2688_v45 = vpop.f32.mrb[43].mxu0  ;;  %2928 = vrcp.f32 %v1124_v31  ;;  %v1267_v22 = vpop.f32.mrb[42].mxu1 }
 0x49b   :  { %v2919_v33 = vpop.eup %2918  ;;  %v2694_v32 = vpop.f32.mrb[43].mxu1 }
 0x49c   :  { %v2921_v38 = vpop.eup %2920  ;;  %v1127_v23 = vpop.xlane.xlu1 %1126  ;;  %v1554_v35 = vmul.f32 %v2919_v33, %v1220_v8 }
 0x49d   :  { %2930 = vrcp.f32 %v1127_v23  ;;  %v1555_v39 = vmul.f32 %v2921_v38, %v1264_v2  ;;  %v1130_v51 = vpop.xlane.xlu0 %1129  ;;  %v2923_v15 = vpop.eup %2922 }
 0x49e   :  { %v1311_v47 = vpop.f32.mrb[44].mxu0  ;;  %1570 = vst [vmem:[#allocation10 + $0x8] sm:$0xff] %v1554_v35  ;;  %2932 = vrcp.f32 %v1130_v51  ;;  %v2925_v62 = vpop.eup %2924  ;;  %v1556_v36 = vmul.f32 %v2923_v15, %v1267_v22 }
 0x49f   :  { %v2699_v53 = vpop.f32.mrb[45].mxu0  ;;  %1571 = vst [vmem:[#allocation10 + $0x10] sm:$0xff] %v1555_v39  ;;  %v1557_v29 = vmul.f32 %v2925_v62, %v1311_v47 }
 0x4a0   :  { %v1314_v20 = vpop.f32.mrb[46].mxu0  ;;  %v1358_v40 = vpop.f32.mrb[44].mxu1  ;;  %1572 = vst [vmem:[#allocation10 + $0x18] sm:$0xff] %v1556_v36 }
 0x4a1   :  { %v1133_v49 = vpop.xlane.xlu1 %1132  ;;  %v2705_v1 = vpop.f32.mrb[45].mxu1  ;;  %1573 = vst [vmem:[#allocation10 + $0x20] sm:$0xff] %v1557_v29 }
 0x4a2   :  { %2934 = vrcp.f32 %v1133_v49  ;;  %v1136_v5 = vpop.xlane.xlu0 %1135  ;;  %v2700_v57 = vpop.f32.mrb[47].mxu0 }
 0x4a3   :  { %v1361_v52 = vpop.f32.mrb[46].mxu1  ;;  %v2927_v27 = vpop.eup %2926  ;;  %2936 = vrcp.f32 %v1136_v5 }
 0x4a4   :  { %v2706_v55 = vpop.f32.mrb[47].mxu1  ;;  %v2929_v10 = vpop.eup %2928  ;;  %v1558_v7 = vmul.f32 %v2927_v27, %v1314_v20 }
 0x4a5   :  { %v1139_v3 = vpop.xlane.xlu1 %1138  ;;  %v1559_v59 = vmul.f32 %v2929_v10, %v1358_v40 }
 0x4a6   :  { %2938 = vrcp.f32 %v1139_v3  ;;  %v1405_v44 = vpop.f32.mrb[48].mxu0  ;;  %1574 = vst [vmem:[#allocation10 + $0x28] sm:$0xff] %v1558_v7  ;;  %v1142_v9 = vpop.xlane.xlu0 %1141 }
 0x4a7   :  { %v2711_v13 = vpop.f32.mrb[49].mxu0  ;;  %v2931_v63 = vpop.eup %2930  ;;  %1575 = vst [vmem:[#allocation10 + $0x30] sm:$0xff] %v1559_v59  ;;  %2940 = vrcp.f32 %v1142_v9 }
 0x4a8   :  { %v1408_v21 = vpop.f32.mrb[50].mxu0  ;;  %v2933_v50 = vpop.eup %2932  ;;  %v1560_v4 = vmul.f32 %v2931_v63, %v1361_v52 }
 0x4a9   :  { %v2712_v18 = vpop.f32.mrb[51].mxu0  ;;  %v1561_v56 = vmul.f32 %v2933_v50, %v1405_v44  ;;  %v1145_v16 = vpop.xlane.xlu1 %1144 }
 0x4aa   :  { %1576 = vst [vmem:[#allocation10 + $0x38] sm:$0xff] %v1560_v4  ;;  %2942 = vrcp.f32 %v1145_v16  ;;  %v1148_v37 = vpop.xlane.xlu0 %1147 }
 0x4ab   :  { %1577 = vst [vmem:[#allocation10 + $0x40] sm:$0xff] %v1561_v56  ;;  %2944 = vrcp.f32 %v1148_v37 }
 0x4ac   :  { %v2935_v58 = vpop.eup %2934 }
 0x4ad   :  { %v1562_v42 = vmul.f32 %v2935_v58, %v1408_v21  ;;  %v2937_v26 = vpop.eup %2936  ;;  %v1151_v30 = vpop.xlane.xlu1 %1150 }
 0x4ae   :  { %v1452_v61 = vpop.f32.mrb[48].mxu1  ;;  %2946 = vrcp.f32 %v1151_v30 }
 0x4af   :  { %1578 = vst [vmem:[#allocation10 + $0x48] sm:$0xff] %v1562_v42  ;;  %v1563_v6 = vmul.f32 %v2937_v26, %v1452_v61  ;;  %v2717_v43 = vpop.f32.mrb[49].mxu1 }
 0x4b0   :  { %v2939_v11 = vpop.eup %2938  ;;  %v1455_v34 = vpop.f32.mrb[50].mxu1 }
 0x4b1   :  { %1579 = vst [vmem:[#allocation10 + $0x50] sm:$0xff] %v1563_v6  ;;  %v1564_v25 = vmul.f32 %v2939_v11, %v1455_v34  ;;  %v2718_v14 = vpop.f32.mrb[51].mxu1  ;;  %v2941_v17 = vpop.eup %2940 }
 0x4b3   :  { %1580 = vst [vmem:[#allocation10 + $0x58] sm:$0xff] %v1564_v25 }
 0x4b4   :  { %v2943_v60 = vpop.eup %2942 }
 0x4b5   :  { %v2945_v2 = vpop.eup %2944 }
 0x4b7   :  { %v1499_v48 = vpop.f32.mrb[52].mxu0 }
 0x4b8   :  { %v1565_v19 = vmul.f32 %v2941_v17, %v1499_v48  ;;  %v2723_v54 = vpop.f32.mrb[53].mxu0  ;;  %v2947_v31 = vpop.eup %2946 }
 0x4b9   :  { %v1502_v12 = vpop.f32.mrb[54].mxu0 }
 0x4ba   :  { %1581 = vst [vmem:[#allocation10 + $0x60] sm:$0xff] %v1565_v19  ;;  %v1566_v41 = vmul.f32 %v2943_v60, %v1502_v12  ;;  %v2724_v8 = vpop.f32.mrb[55].mxu0 }
 0x4bc   :  { %1582 = vst [vmem:[#allocation10 + $0x68] sm:$0xff] %v1566_v41 }
 0x4bd   :  { %v1546_v46 = vpop.f32.mrb[52].mxu1 }
 0x4be   :  { %v1567_v24 = vmul.f32 %v2945_v2, %v1546_v46  ;;  %v2729_v0 = vpop.f32.mrb[53].mxu1 }
 0x4bf   :  { %v1549_v28 = vpop.f32.mrb[54].mxu1 }
 0x4c0   :  { %1583 = vst [vmem:[#allocation10 + $0x70] sm:$0xff] %v1567_v24  ;;  %v1568_v45 = vmul.f32 %v2947_v31, %v1549_v28  ;;  %v2730_v22 = vpop.f32.mrb[55].mxu1 }
 0x4c2   :  { %1584 = vst [vmem:[#allocation10 + $0x78] sm:$0xff] %v1568_v45 }
 0x4c3   :  { %3055 = shalt.err (!%p3052_p8)
}
 0x4c4   :  { %s3056_s8 = scalar_lea.hbm %s3782_s6, 2048 }
 0x4c5   :  { %p3057_p9 = scmp.ne.s32.totalorder %s3782_s6, %s3056_s8  ;;  %p3060_p10 = scmp.lt.u32.totalorder %s3056_s8, %s3782_s6 }
 0x4c7   :  { %p3062_p11 = pnand %p3060_p10, %p3057_p9 }
 0x4c9   :  { %3065 = shalt.err (!%p3062_p11)
}
 0x4ca   :  { %s3107_s15 = smov 128   ;;  %s3108_s16 = smov 8   ;;  %v2332_v33 = vpop.permute.xlu0 %2331  ;;  %v2335_v35 = vpop.permute.xlu1 %2334 }
 0x4cb   :  { %2381 = dma.vmem_to_hbm [thread:$0]  %s2376_s26, 2048, %s3782_s6, [#allocation4], %s3107_s15, %s3107_s15, %s3108_s16  }
 0x4cc   :  { %s3109_s6 = smov [#allocation11]  }
 0x4cd   :  { %s2387_s17 = sshll.u32 %s3109_s6, 4  ;;  %s2388_s17 = int_to_ptr.vmem [resolvable:$true] %s2387_s17 }
 0x4ce   :  { %v2338_v40 = vpop.permute.xlu1 %2337  ;;  %v2344_v7 = vpop.permute.xlu0 %2343  ;;  %s3066_s18 = scalar_lea.vmem %s2388_s17, 1024  ;;  %p3071_p13 = scmp.lt.s32.totalorder %s2388_s17, %s2388_s17 }
 0x4cf   :  { %p3067_p12 = scmp.ne.s32.totalorder %s2388_s17, %s3066_s18  ;;  %p3072_p0 = scmp.lt.s32.totalorder %s3066_s18, %s3066_s18 }
 0x4d1   :  { %p3073_p1 = por %p3072_p0, %p3071_p13 }
 0x4d2   :  { %v2341_v49 = vpop.permute.xlu1 %2340  ;;  %v2350_v42 = vpop.permute.xlu0 %2349 }
 0x4d3   :  { %p3074_p2 = pnand %p3073_p1, %p3067_p12 }
 0x4d6   :  { %v2347_v44 = vpop.permute.xlu1 %2346 }
 0x4da   :  { %v2353_v16 = vpop.permute.xlu1 %2352 }
 0x515   :  { %v1911_v32 = vpop.f32.mrb[56].mxu0 }
 0x516   :  { %v2354_v38 = vmul.f32 %v2332_v33, %v1911_v32  ;;  %v2735_v23 = vpop.f32.mrb[57].mxu0 }
 0x517   :  { %v1914_v39 = vpop.f32.mrb[58].mxu0 }
 0x518   :  { %2362 = vst [vmem:[#allocation11] sm:$0xff] %v2354_v38  ;;  %v2736_v51 = vpop.f32.mrb[59].mxu0 }
 0x51a   :  { %v1970_v47 = vpop.f32.mrb[56].mxu1 }
 0x51b   :  { %v2355_v53 = vmul.f32 %v2335_v35, %v1970_v47  ;;  %v2741_v15 = vpop.f32.mrb[57].mxu1 }
 0x51c   :  { %v1973_v20 = vpop.f32.mrb[58].mxu1 }
 0x51d   :  { %2363 = vst [vmem:[#allocation11 + $0x8] sm:$0xff] %v2355_v53  ;;  %v2742_v62 = vpop.f32.mrb[59].mxu1 }
 0x520   :  { %v2029_v36 = vpop.f32.mrb[60].mxu0 }
 0x521   :  { %v2356_v1 = vmul.f32 %v2338_v40, %v2029_v36  ;;  %v2747_v5 = vpop.f32.mrb[61].mxu0 }
 0x522   :  { %v2088_v29 = vpop.f32.mrb[60].mxu1  ;;  %v2032_v57 = vpop.f32.mrb[62].mxu0 }
 0x523   :  { %2364 = vst [vmem:[#allocation11 + $0x10] sm:$0xff] %v2356_v1  ;;  %v2357_v52 = vmul.f32 %v2341_v49, %v2088_v29  ;;  %v2748_v27 = vpop.f32.mrb[63].mxu0  ;;  %v2753_v55 = vpop.f32.mrb[61].mxu1 }
 0x524   :  { %v2091_v10 = vpop.f32.mrb[62].mxu1 }
 0x525   :  { %2365 = vst [vmem:[#allocation11 + $0x18] sm:$0xff] %v2357_v52  ;;  %v2754_v3 = vpop.f32.mrb[63].mxu1 }
 0x528   :  { %v2147_v59 = vpop.f32.mrb[64].mxu0 }
 0x529   :  { %v2358_v13 = vmul.f32 %v2344_v7, %v2147_v59  ;;  %v2759_v63 = vpop.f32.mrb[65].mxu0 }
 0x52a   :  { %v2206_v21 = vpop.f32.mrb[64].mxu1  ;;  %v2150_v50 = vpop.f32.mrb[66].mxu0 }
 0x52b   :  { %2366 = vst [vmem:[#allocation11 + $0x20] sm:$0xff] %v2358_v13  ;;  %v2359_v4 = vmul.f32 %v2347_v44, %v2206_v21  ;;  %v2760_v18 = vpop.f32.mrb[67].mxu0  ;;  %v2765_v56 = vpop.f32.mrb[65].mxu1 }
 0x52c   :  { %v2209_v58 = vpop.f32.mrb[66].mxu1 }
 0x52d   :  { %2367 = vst [vmem:[#allocation11 + $0x28] sm:$0xff] %v2359_v4  ;;  %v2766_v9 = vpop.f32.mrb[67].mxu1 }
 0x530   :  { %v2265_v26 = vpop.f32.mrb[68].mxu0 }
 0x531   :  { %v2360_v61 = vmul.f32 %v2350_v42, %v2265_v26  ;;  %v2771_v6 = vpop.f32.mrb[69].mxu0 }
 0x532   :  { %v2324_v43 = vpop.f32.mrb[68].mxu1  ;;  %v2268_v11 = vpop.f32.mrb[70].mxu0 }
 0x533   :  { %2368 = vst [vmem:[#allocation11 + $0x30] sm:$0xff] %v2360_v61  ;;  %v2361_v34 = vmul.f32 %v2353_v16, %v2324_v43  ;;  %v2777_v25 = vpop.f32.mrb[69].mxu1  ;;  %v2772_v14 = vpop.f32.mrb[71].mxu0 }
 0x534   :  { %v2327_v37 = vpop.f32.mrb[70].mxu1 }
 0x535   :  { %2369 = vst [vmem:[#allocation11 + $0x38] sm:$0xff] %v2361_v34  ;;  %v2778_v30 = vpop.f32.mrb[71].mxu1 }
 0x536   :  { %3077 = shalt.err (!%p3074_p2)
}
 0x537   :  { %s3078_s21 = scalar_lea.hbm %s3783_s7, 1024 }
 0x538   :  { %p3079_p3 = scmp.ne.s32.totalorder %s3783_s7, %s3078_s21  ;;  %p3082_p4 = scmp.lt.u32.totalorder %s3078_s21, %s3783_s7 }
 0x53a   :  { %p3084_p5 = pnand %p3082_p4, %p3079_p3 }
 0x53c   :  { %3087 = shalt.err (!%p3084_p5)
}
 0x53d   :  { %2393 = dma.vmem_to_hbm [thread:$0]  %s2388_s17, 1024, %s3783_s7, [#allocation12], %s3107_s15, %s3107_s15, %s3108_s16  }
 0x53e   :  { %3094 = dma.done.wait [#allocation4], 2048  }
 0x53f   :  { %3095 = vsyncadd [#allocation4], 4294965248 }
 0x540   :  { %3096 = dma.done.wait [#allocation12], 1024  }
 0x541   :  { %3097 = vsyncadd [#allocation12], 4294966272 }
 0x542   :  { %2400 = vsyncpa [#allocation3], 1 }
 0x543   :  { %2401 = vsyncpa [#allocation6], 1 }
 0x544   :  { %2402 = vsyncpa [#allocation9], 1 }
 0x545   :  { %2403 = vsyncpa [#allocation4], 1 }
 0x546   :  { %2404 = vsyncpa [#allocation12], 1 }

</bundles_post_ra>
